<compile_context>
chip_gen: v7x
topology: tpu7x:2x2x1
jax: 0.10.0
libtpu: 0.0.40
codegen_flags: <defaults>
</compile_context>

<pallas_src>
import functools

import jax
import jax.numpy as jnp
from jax.experimental import pallas as pl
from jax.experimental.pallas import tpu as pltpu

NEG_SLOPE = 0.2


# ---------------------------------------------------------------------------
# Kernel 1: shared projection + attention logits (small; everything in VMEM).
# ---------------------------------------------------------------------------
def _proj_kernel(x_ref, w_ref, al_ref, ar_ref, feat_ref, el_ref, er_ref, *, num_heads):
    x = x_ref[...].astype(jnp.bfloat16)          # [N, F]  bf16 MXU operand
    al = al_ref[...]                             # [H, C]  f32
    ar = ar_ref[...]                             # [H, C]  f32

    for h in range(num_heads):                   # static unroll, H=4
        # per-head projection: [N, F] @ [F, C] -> [N, C], f32 accumulation
        fh = jnp.dot(x, w_ref[h], preferred_element_type=jnp.float32)
        feat_ref[h] = fh.astype(jnp.bfloat16)    # bf16 values for the aggregation MXU
        # attention logits stay in f32 (feeds exp later)
        el_ref[h] = jnp.sum(fh * al[h:h + 1, :], axis=-1, keepdims=True)   # [N, 1]
        er_ref[h] = jnp.sum(fh * ar[h:h + 1, :], axis=-1, keepdims=True)   # [N, 1]


# ---------------------------------------------------------------------------
# Kernel 2: masked softmax + aggregation, tiled over destination nodes.
# ---------------------------------------------------------------------------
def _attn_kernel(adj_ref, feat_ref, el_ref, er_ref, o_ref, *, num_heads):
    # adj tile [T, N] int8 -> f32 mask, computed ONCE (hoisted out of the head loop)
    adjf = adj_ref[...].astype(jnp.float32)
    mask = adjf > 0.0
    neg_big = jnp.float32(-1e30)

    t = adj_ref.shape[0]
    c = feat_ref.shape[2]
    acc = jnp.zeros((t, c), jnp.float32)

    for h in range(num_heads):                   # static unroll, H=4
        el_h = el_ref[h]                         # [1, N]  (src logits)
        er_h = er_ref[h]                         # [T, 1]  (dst logits)
        e = er_h + el_h                          # [T, N]
        e = jnp.maximum(e, NEG_SLOPE * e)        # LeakyReLU as a single vmax
        e = jnp.where(mask, e, neg_big)

        m = jnp.max(e, axis=1, keepdims=True)    # [T, 1]
        p = jnp.where(mask, jnp.exp(e - m), 0.0) # [T, N] un-normalized weights
        denom = jnp.sum(p, axis=1, keepdims=True)

        # Aggregate with un-normalized weights on the MXU (bf16 x bf16 -> f32),
        # then scale the small [T, C] result instead of dividing the [T, N] matrix.
        agg = jnp.dot(p.astype(jnp.bfloat16), feat_ref[h],
                      preferred_element_type=jnp.float32)          # [T, C]
        inv = pl.reciprocal(jnp.where(denom > 0, denom, 1.0), approx=True)
        acc = acc + agg * inv                    # zero in-degree rows stay zero (p == 0)

    acc = acc * (1.0 / num_heads)                # mean over heads
    o_ref[...] = jnp.maximum(acc, 0.0)           # activation = ReLU


def _pick_tile(n):
    # Largest candidate dividing n with >= 2 grid steps so the adj DMA pipelines;
    # fall back to any divisor, then to the whole axis.
    for t in (512, 256, 128, 64, 32):
        if n % t == 0 and n // t >= 2:
            return t
    for t in (512, 256, 128, 64, 32):
        if n % t == 0:
            return t
    return n


def gat_forward(x, w, attn_l, attn_r, adj, *, num_heads, out_feats, tile_dst=None):
    n, in_feats = x.shape
    h, c = num_heads, out_feats

    # Per-head weights [H, F, C] (bf16 MXU operand) -- avoids lane-slicing feat per head.
    w_hfc = jnp.transpose(w.reshape(in_feats, h, c), (1, 0, 2)).astype(jnp.bfloat16)

    # Adjacency is only ever a >0 mask: ship it as int8 (4x less HBM traffic than f32).
    adj_i8 = adj if adj.dtype == jnp.int8 else (adj > 0).astype(jnp.int8)

    # --- Kernel 1: projection (small) -------------------------------------
    feat_bf, el_col, er_col = pl.pallas_call(
        functools.partial(_proj_kernel, num_heads=h),
        out_shape=(jax.ShapeDtypeStruct((h, n, c), jnp.bfloat16),
                   jax.ShapeDtypeStruct((h, n, 1), jnp.float32),
                   jax.ShapeDtypeStruct((h, n, 1), jnp.float32)),
        in_specs=[pl.BlockSpec(memory_space=pltpu.MemorySpace.VMEM)] * 4,
        out_specs=(pl.BlockSpec(memory_space=pltpu.MemorySpace.VMEM),) * 3,
    )(x, w_hfc, attn_l, attn_r)

    # Wrapper-side layout plumbing: el as a lane-dense row per head [H, 1, N].
    el_row = jnp.transpose(el_col, (0, 2, 1))

    # --- Kernel 2: attention + aggregation, gridded over dst tiles --------
    tile = tile_dst if tile_dst is not None else _pick_tile(n)
    grid = (n // tile,)

    out = pl.pallas_call(
        functools.partial(_attn_kernel, num_heads=h),
        out_shape=jax.ShapeDtypeStruct((n, c), jnp.float32),
        grid_spec=pltpu.PrefetchScalarGridSpec(
            num_scalar_prefetch=0,
            grid=grid,
            in_specs=[
                pl.BlockSpec((tile, n), lambda i: (i, 0)),        # adj   [T, N] int8 (streamed)
                pl.BlockSpec((h, n, c), lambda i: (0, 0, 0)),     # feat  [H, N, C] bf16 (resident)
                pl.BlockSpec((h, 1, n), lambda i: (0, 0, 0)),     # el    [H, 1, N] f32 (resident)
                pl.BlockSpec((h, tile, 1), lambda i: (0, i, 0)),  # er    [H, T, 1] f32 (per tile)
            ],
            out_specs=pl.BlockSpec((tile, c), lambda i: (i, 0)),  # out   [T, C]
        ),
        compiler_params=pltpu.CompilerParams(
            dimension_semantics=("parallel",),        # megacore split over dst tiles
            vmem_limit_bytes=32 * 1024 * 1024,        # explicit, safe on v5e/v6e/v7x
        ),
    )(adj_i8, feat_bf, el_row, er_col)
    # TODO(synk): for very large N add a second (src) grid axis with an online
    # flash-style softmax so the per-step working set is (TILE_DST x TILE_SRC).
    return out


def gat_reference(x, w, attn_l, attn_r, adj, *, num_heads, out_feats):
    """Pure-JAX f32 reference of the same math (correctness check)."""
    n = x.shape[0]
    feat = (x @ w).reshape(n, num_heads, out_feats)              # [N, H, C]
    el = jnp.sum(feat * attn_l[None], axis=-1)                   # [N, H]
    er = jnp.sum(feat * attn_r[None], axis=-1)                   # [N, H]
    e = er[:, None, :] + el[None, :, :]                          # [dst, src, H]
    e = jnp.where(e > 0, e, NEG_SLOPE * e)
    mask = (adj > 0)[:, :, None]
    e = jnp.where(mask, e, -1e30)
    m = jnp.max(e, axis=1, keepdims=True)
    p = jnp.where(mask, jnp.exp(e - m), 0.0)
    denom = jnp.sum(p, axis=1, keepdims=True)
    a = p / jnp.where(denom > 0, denom, 1.0)                     # [dst, src, H]
    out = jnp.einsum("dsh,shc->dhc", a, feat)                    # [N, H, C]
    return jnp.maximum(out.mean(axis=1), 0.0)


if __name__ == "__main__":
    N, F, C, H = 128, 32, 16, 4   # nodes, in_feats, n_classes, num_heads

    key = jax.random.PRNGKey(0)
    k_x, k_w, k_al, k_ar, k_adj = jax.random.split(key, 5)

    x = jax.random.normal(k_x, (N, F), jnp.float32)
    w = jax.random.normal(k_w, (F, H * C), jnp.float32) * 0.1      # fc weight (F -> H*C)
    attn_l = jax.random.normal(k_al, (H, C), jnp.float32) * 0.1
    attn_r = jax.random.normal(k_ar, (H, C), jnp.float32) * 0.1
    # Dense adjacency mask adj[dst, src], ~30% density, shipped as int8.
    adj = (jax.random.uniform(k_adj, (N, N)) < 0.3).astype(jnp.int8)

    out = gat_forward(x, w, attn_l, attn_r, adj, num_heads=H, out_feats=C)
    jax.block_until_ready(out)

    ref = gat_reference(x, w, attn_l, attn_r, adj, num_heads=H, out_feats=C)
    assert out.shape == (N, C)
    max_err = float(jnp.max(jnp.abs(out - ref)))
    # bf16 MXU operands + approx reciprocal -> compare at bf16-level tolerance.
    assert jnp.allclose(out, ref, atol=2e-2, rtol=2e-2), f"mismatch vs JAX reference (max |err|={max_err})"

    print("KERNEL_OK")
</pallas_src>

<mosaic_0001>
module attributes {stable_mosaic.version = 11 : i64} {
  func.func @_proj_kernel(%arg0: memref<128x32xf32, #tpu.memory_space<vmem>>, %arg1: memref<4x32x16xbf16, #tpu.memory_space<vmem>>, %arg2: memref<4x16xf32, #tpu.memory_space<vmem>>, %arg3: memref<4x16xf32, #tpu.memory_space<vmem>>, %arg4: memref<4x128x16xbf16, #tpu.memory_space<vmem>>, %arg5: memref<4x128x1xf32, #tpu.memory_space<vmem>>, %arg6: memref<4x128x1xf32, #tpu.memory_space<vmem>>) attributes {dimension_semantics = [], scalar_prefetch = 0 : i64, scratch_operands = 0 : i64, tpu.core_type = #tpu.core_type<tc>} {
    %c0 = arith.constant 0 : index
    %c0_0 = arith.constant 0 : index
    %0 = vector.load %arg0[%c0, %c0_0] : memref<128x32xf32, #tpu.memory_space<vmem>>, vector<128x32xf32>
    %1 = arith.truncf %0 : vector<128x32xf32> to vector<128x32xbf16>
    %c0_1 = arith.constant 0 : index
    %c0_2 = arith.constant 0 : index
    %2 = vector.load %arg2[%c0_1, %c0_2] : memref<4x16xf32, #tpu.memory_space<vmem>>, vector<4x16xf32>
    %c0_3 = arith.constant 0 : index
    %c0_4 = arith.constant 0 : index
    %3 = vector.load %arg3[%c0_3, %c0_4] : memref<4x16xf32, #tpu.memory_space<vmem>>, vector<4x16xf32>
    %c0_5 = arith.constant 0 : index
    %c0_6 = arith.constant 0 : index
    %c0_7 = arith.constant 0 : index
    %4 = vector.load %arg1[%c0_5, %c0_6, %c0_7] : memref<4x32x16xbf16, #tpu.memory_space<vmem>>, vector<1x32x16xbf16>
    %5 = vector.shape_cast %4 : vector<1x32x16xbf16> to vector<32x16xbf16>
    %cst = arith.constant dense<0.000000e+00> : vector<128x16xf32>
    %6 = tpu.matmul %1, %5, %cst {dimension_numbers = #tpu.dot_dimension_numbers<[1], [0], [0], [1], [0, 0, 1, 1], [], []>} : vector<128x32xbf16>, vector<32x16xbf16>, vector<128x16xf32> -> vector<128x16xf32>
    %7 = arith.truncf %6 : vector<128x16xf32> to vector<128x16xbf16>
    %c0_8 = arith.constant 0 : index
    %c0_9 = arith.constant 0 : index
    %c0_10 = arith.constant 0 : index
    %8 = vector.load %arg4[%c0_8, %c0_9, %c0_10] : memref<4x128x16xbf16, #tpu.memory_space<vmem>>, vector<1x128x16xbf16>
    %9 = vector.shape_cast %8 : vector<1x128x16xbf16> to vector<128x16xbf16>
    %10 = vector.shape_cast %7 : vector<128x16xbf16> to vector<1x128x16xbf16>
    tpu.vector_store %arg4[%c0_8, %c0_9, %c0_10], %10 {strides = array<i32>} : memref<4x128x16xbf16, #tpu.memory_space<vmem>>, vector<1x128x16xbf16>,
    %11 = vector.extract_strided_slice %2 {offsets = [0, 0], sizes = [1, 16], strides = [1, 1]} : vector<4x16xf32> to vector<1x16xf32>
    %12 = vector.broadcast %11 : vector<1x16xf32> to vector<128x16xf32>
    %13 = arith.mulf %6, %12 : vector<128x16xf32>
    %cst_11 = arith.constant dense<0.000000e+00> : vector<128xf32>
    %14 = vector.multi_reduction <add>, %13, %cst_11 [1] : vector<128x16xf32> to vector<128xf32>
    %15 = vector.shape_cast %14 : vector<128xf32> to vector<128x1xf32>
    %c0_12 = arith.constant 0 : index
    %c0_13 = arith.constant 0 : index
    %c0_14 = arith.constant 0 : index
    %16 = vector.load %arg5[%c0_12, %c0_13, %c0_14] : memref<4x128x1xf32, #tpu.memory_space<vmem>>, vector<1x128x1xf32>
    %17 = vector.shape_cast %16 : vector<1x128x1xf32> to vector<128x1xf32>
    %18 = vector.shape_cast %15 : vector<128x1xf32> to vector<1x128x1xf32>
    tpu.vector_store %arg5[%c0_12, %c0_13, %c0_14], %18 {strides = array<i32>} : memref<4x128x1xf32, #tpu.memory_space<vmem>>, vector<1x128x1xf32>,
    %19 = vector.extract_strided_slice %3 {offsets = [0, 0], sizes = [1, 16], strides = [1, 1]} : vector<4x16xf32> to vector<1x16xf32>
    %20 = vector.broadcast %19 : vector<1x16xf32> to vector<128x16xf32>
    %21 = arith.mulf %6, %20 : vector<128x16xf32>
    %cst_15 = arith.constant dense<0.000000e+00> : vector<128xf32>
    %22 = vector.multi_reduction <add>, %21, %cst_15 [1] : vector<128x16xf32> to vector<128xf32>
    %23 = vector.shape_cast %22 : vector<128xf32> to vector<128x1xf32>
    %c0_16 = arith.constant 0 : index
    %c0_17 = arith.constant 0 : index
    %c0_18 = arith.constant 0 : index
    %24 = vector.load %arg6[%c0_16, %c0_17, %c0_18] : memref<4x128x1xf32, #tpu.memory_space<vmem>>, vector<1x128x1xf32>
    %25 = vector.shape_cast %24 : vector<1x128x1xf32> to vector<128x1xf32>
    %26 = vector.shape_cast %23 : vector<128x1xf32> to vector<1x128x1xf32>
    tpu.vector_store %arg6[%c0_16, %c0_17, %c0_18], %26 {strides = array<i32>} : memref<4x128x1xf32, #tpu.memory_space<vmem>>, vector<1x128x1xf32>,
    %c1 = arith.constant 1 : index
    %c0_19 = arith.constant 0 : index
    %c0_20 = arith.constant 0 : index
    %27 = vector.load %arg1[%c1, %c0_19, %c0_20] : memref<4x32x16xbf16, #tpu.memory_space<vmem>>, vector<1x32x16xbf16>
    %28 = vector.shape_cast %27 : vector<1x32x16xbf16> to vector<32x16xbf16>
    %cst_21 = arith.constant dense<0.000000e+00> : vector<128x16xf32>
    %29 = tpu.matmul %1, %28, %cst_21 {dimension_numbers = #tpu.dot_dimension_numbers<[1], [0], [0], [1], [0, 0, 1, 1], [], []>} : vector<128x32xbf16>, vector<32x16xbf16>, vector<128x16xf32> -> vector<128x16xf32>
    %30 = arith.truncf %29 : vector<128x16xf32> to vector<128x16xbf16>
    %c1_22 = arith.constant 1 : index
    %c0_23 = arith.constant 0 : index
    %c0_24 = arith.constant 0 : index
    %31 = vector.load %arg4[%c1_22, %c0_23, %c0_24] : memref<4x128x16xbf16, #tpu.memory_space<vmem>>, vector<1x128x16xbf16>
    %32 = vector.shape_cast %31 : vector<1x128x16xbf16> to vector<128x16xbf16>
    %33 = vector.shape_cast %30 : vector<128x16xbf16> to vector<1x128x16xbf16>
    tpu.vector_store %arg4[%c1_22, %c0_23, %c0_24], %33 {strides = array<i32>} : memref<4x128x16xbf16, #tpu.memory_space<vmem>>, vector<1x128x16xbf16>,
    %34 = vector.extract_strided_slice %2 {offsets = [1, 0], sizes = [1, 16], strides = [1, 1]} : vector<4x16xf32> to vector<1x16xf32>
    %35 = vector.broadcast %34 : vector<1x16xf32> to vector<128x16xf32>
    %36 = arith.mulf %29, %35 : vector<128x16xf32>
    %cst_25 = arith.constant dense<0.000000e+00> : vector<128xf32>
    %37 = vector.multi_reduction <add>, %36, %cst_25 [1] : vector<128x16xf32> to vector<128xf32>
    %38 = vector.shape_cast %37 : vector<128xf32> to vector<128x1xf32>
    %c1_26 = arith.constant 1 : index
    %c0_27 = arith.constant 0 : index
    %c0_28 = arith.constant 0 : index
    %39 = vector.load %arg5[%c1_26, %c0_27, %c0_28] : memref<4x128x1xf32, #tpu.memory_space<vmem>>, vector<1x128x1xf32>
    %40 = vector.shape_cast %39 : vector<1x128x1xf32> to vector<128x1xf32>
    %41 = vector.shape_cast %38 : vector<128x1xf32> to vector<1x128x1xf32>
    tpu.vector_store %arg5[%c1_26, %c0_27, %c0_28], %41 {strides = array<i32>} : memref<4x128x1xf32, #tpu.memory_space<vmem>>, vector<1x128x1xf32>,
    %42 = vector.extract_strided_slice %3 {offsets = [1, 0], sizes = [1, 16], strides = [1, 1]} : vector<4x16xf32> to vector<1x16xf32>
    %43 = vector.broadcast %42 : vector<1x16xf32> to vector<128x16xf32>
    %44 = arith.mulf %29, %43 : vector<128x16xf32>
    %cst_29 = arith.constant dense<0.000000e+00> : vector<128xf32>
    %45 = vector.multi_reduction <add>, %44, %cst_29 [1] : vector<128x16xf32> to vector<128xf32>
    %46 = vector.shape_cast %45 : vector<128xf32> to vector<128x1xf32>
    %c1_30 = arith.constant 1 : index
    %c0_31 = arith.constant 0 : index
    %c0_32 = arith.constant 0 : index
    %47 = vector.load %arg6[%c1_30, %c0_31, %c0_32] : memref<4x128x1xf32, #tpu.memory_space<vmem>>, vector<1x128x1xf32>
    %48 = vector.shape_cast %47 : vector<1x128x1xf32> to vector<128x1xf32>
    %49 = vector.shape_cast %46 : vector<128x1xf32> to vector<1x128x1xf32>
    tpu.vector_store %arg6[%c1_30, %c0_31, %c0_32], %49 {strides = array<i32>} : memref<4x128x1xf32, #tpu.memory_space<vmem>>, vector<1x128x1xf32>,
    %c2 = arith.constant 2 : index
    %c0_33 = arith.constant 0 : index
    %c0_34 = arith.constant 0 : index
    %50 = vector.load %arg1[%c2, %c0_33, %c0_34] : memref<4x32x16xbf16, #tpu.memory_space<vmem>>, vector<1x32x16xbf16>
    %51 = vector.shape_cast %50 : vector<1x32x16xbf16> to vector<32x16xbf16>
    %cst_35 = arith.constant dense<0.000000e+00> : vector<128x16xf32>
    %52 = tpu.matmul %1, %51, %cst_35 {dimension_numbers = #tpu.dot_dimension_numbers<[1], [0], [0], [1], [0, 0, 1, 1], [], []>} : vector<128x32xbf16>, vector<32x16xbf16>, vector<128x16xf32> -> vector<128x16xf32>
    %53 = arith.truncf %52 : vector<128x16xf32> to vector<128x16xbf16>
    %c2_36 = arith.constant 2 : index
    %c0_37 = arith.constant 0 : index
    %c0_38 = arith.constant 0 : index
    %54 = vector.load %arg4[%c2_36, %c0_37, %c0_38] : memref<4x128x16xbf16, #tpu.memory_space<vmem>>, vector<1x128x16xbf16>
    %55 = vector.shape_cast %54 : vector<1x128x16xbf16> to vector<128x16xbf16>
    %56 = vector.shape_cast %53 : vector<128x16xbf16> to vector<1x128x16xbf16>
    tpu.vector_store %arg4[%c2_36, %c0_37, %c0_38], %56 {strides = array<i32>} : memref<4x128x16xbf16, #tpu.memory_space<vmem>>, vector<1x128x16xbf16>,
    %57 = vector.extract_strided_slice %2 {offsets = [2, 0], sizes = [1, 16], strides = [1, 1]} : vector<4x16xf32> to vector<1x16xf32>
    %58 = vector.broadcast %57 : vector<1x16xf32> to vector<128x16xf32>
    %59 = arith.mulf %52, %58 : vector<128x16xf32>
    %cst_39 = arith.constant dense<0.000000e+00> : vector<128xf32>
    %60 = vector.multi_reduction <add>, %59, %cst_39 [1] : vector<128x16xf32> to vector<128xf32>
    %61 = vector.shape_cast %60 : vector<128xf32> to vector<128x1xf32>
    %c2_40 = arith.constant 2 : index
    %c0_41 = arith.constant 0 : index
    %c0_42 = arith.constant 0 : index
    %62 = vector.load %arg5[%c2_40, %c0_41, %c0_42] : memref<4x128x1xf32, #tpu.memory_space<vmem>>, vector<1x128x1xf32>
    %63 = vector.shape_cast %62 : vector<1x128x1xf32> to vector<128x1xf32>
    %64 = vector.shape_cast %61 : vector<128x1xf32> to vector<1x128x1xf32>
    tpu.vector_store %arg5[%c2_40, %c0_41, %c0_42], %64 {strides = array<i32>} : memref<4x128x1xf32, #tpu.memory_space<vmem>>, vector<1x128x1xf32>,
    %65 = vector.extract_strided_slice %3 {offsets = [2, 0], sizes = [1, 16], strides = [1, 1]} : vector<4x16xf32> to vector<1x16xf32>
    %66 = vector.broadcast %65 : vector<1x16xf32> to vector<128x16xf32>
    %67 = arith.mulf %52, %66 : vector<128x16xf32>
    %cst_43 = arith.constant dense<0.000000e+00> : vector<128xf32>
    %68 = vector.multi_reduction <add>, %67, %cst_43 [1] : vector<128x16xf32> to vector<128xf32>
    %69 = vector.shape_cast %68 : vector<128xf32> to vector<128x1xf32>
    %c2_44 = arith.constant 2 : index
    %c0_45 = arith.constant 0 : index
    %c0_46 = arith.constant 0 : index
    %70 = vector.load %arg6[%c2_44, %c0_45, %c0_46] : memref<4x128x1xf32, #tpu.memory_space<vmem>>, vector<1x128x1xf32>
    %71 = vector.shape_cast %70 : vector<1x128x1xf32> to vector<128x1xf32>
    %72 = vector.shape_cast %69 : vector<128x1xf32> to vector<1x128x1xf32>
    tpu.vector_store %arg6[%c2_44, %c0_45, %c0_46], %72 {strides = array<i32>} : memref<4x128x1xf32, #tpu.memory_space<vmem>>, vector<1x128x1xf32>,
    %c3 = arith.constant 3 : index
    %c0_47 = arith.constant 0 : index
    %c0_48 = arith.constant 0 : index
    %73 = vector.load %arg1[%c3, %c0_47, %c0_48] : memref<4x32x16xbf16, #tpu.memory_space<vmem>>, vector<1x32x16xbf16>
    %74 = vector.shape_cast %73 : vector<1x32x16xbf16> to vector<32x16xbf16>
    %cst_49 = arith.constant dense<0.000000e+00> : vector<128x16xf32>
    %75 = tpu.matmul %1, %74, %cst_49 {dimension_numbers = #tpu.dot_dimension_numbers<[1], [0], [0], [1], [0, 0, 1, 1], [], []>} : vector<128x32xbf16>, vector<32x16xbf16>, vector<128x16xf32> -> vector<128x16xf32>
    %76 = arith.truncf %75 : vector<128x16xf32> to vector<128x16xbf16>
    %c3_50 = arith.constant 3 : index
    %c0_51 = arith.constant 0 : index
    %c0_52 = arith.constant 0 : index
    %77 = vector.load %arg4[%c3_50, %c0_51, %c0_52] : memref<4x128x16xbf16, #tpu.memory_space<vmem>>, vector<1x128x16xbf16>
    %78 = vector.shape_cast %77 : vector<1x128x16xbf16> to vector<128x16xbf16>
    %79 = vector.shape_cast %76 : vector<128x16xbf16> to vector<1x128x16xbf16>
    tpu.vector_store %arg4[%c3_50, %c0_51, %c0_52], %79 {strides = array<i32>} : memref<4x128x16xbf16, #tpu.memory_space<vmem>>, vector<1x128x16xbf16>,
    %80 = vector.extract_strided_slice %2 {offsets = [3, 0], sizes = [1, 16], strides = [1, 1]} : vector<4x16xf32> to vector<1x16xf32>
    %81 = vector.broadcast %80 : vector<1x16xf32> to vector<128x16xf32>
    %82 = arith.mulf %75, %81 : vector<128x16xf32>
    %cst_53 = arith.constant dense<0.000000e+00> : vector<128xf32>
    %83 = vector.multi_reduction <add>, %82, %cst_53 [1] : vector<128x16xf32> to vector<128xf32>
    %84 = vector.shape_cast %83 : vector<128xf32> to vector<128x1xf32>
    %c3_54 = arith.constant 3 : index
    %c0_55 = arith.constant 0 : index
    %c0_56 = arith.constant 0 : index
    %85 = vector.load %arg5[%c3_54, %c0_55, %c0_56] : memref<4x128x1xf32, #tpu.memory_space<vmem>>, vector<1x128x1xf32>
    %86 = vector.shape_cast %85 : vector<1x128x1xf32> to vector<128x1xf32>
    %87 = vector.shape_cast %84 : vector<128x1xf32> to vector<1x128x1xf32>
    tpu.vector_store %arg5[%c3_54, %c0_55, %c0_56], %87 {strides = array<i32>} : memref<4x128x1xf32, #tpu.memory_space<vmem>>, vector<1x128x1xf32>,
    %88 = vector.extract_strided_slice %3 {offsets = [3, 0], sizes = [1, 16], strides = [1, 1]} : vector<4x16xf32> to vector<1x16xf32>
    %89 = vector.broadcast %88 : vector<1x16xf32> to vector<128x16xf32>
    %90 = arith.mulf %75, %89 : vector<128x16xf32>
    %cst_57 = arith.constant dense<0.000000e+00> : vector<128xf32>
    %91 = vector.multi_reduction <add>, %90, %cst_57 [1] : vector<128x16xf32> to vector<128xf32>
    %92 = vector.shape_cast %91 : vector<128xf32> to vector<128x1xf32>
    %c3_58 = arith.constant 3 : index
    %c0_59 = arith.constant 0 : index
    %c0_60 = arith.constant 0 : index
    %93 = vector.load %arg6[%c3_58, %c0_59, %c0_60] : memref<4x128x1xf32, #tpu.memory_space<vmem>>, vector<1x128x1xf32>
    %94 = vector.shape_cast %93 : vector<1x128x1xf32> to vector<128x1xf32>
    %95 = vector.shape_cast %92 : vector<128x1xf32> to vector<1x128x1xf32>
    tpu.vector_store %arg6[%c3_58, %c0_59, %c0_60], %95 {strides = array<i32>} : memref<4x128x1xf32, #tpu.memory_space<vmem>>, vector<1x128x1xf32>,
    return
  }
}

</mosaic_0001>

<bundles_post_ra>
// kernel: tpu_custom_call.1
= control target key start
LH: loop header
LB: loop body
LE: loop exit
PB: predicated region body
PF: predicated region fallthrough
CT: control target
= control target key end

     0   :  { %vm63_vm0 = vcmask 261120   ;;  %v266_v32 = vlaneseq  ;;  %vm249_vm1 = vcmask 125952   ;;  %vm286_vm2 = vcmask 130048   ;;  %s3582_s1 = inlined_call_operand.vmem [shape: bf16[4,32,16], index: 1, kind: input, shape index: {}]   ;;  %s3583_s0 = inlined_call_operand.vmem [shape: f32[128,32], index: 0, kind: input, shape index: {}]   ;;  %s3584_s3 = inlined_call_operand.vmem [shape: f32[4,16], index: 3, kind: input, shape index: {}]   ;;  %s3585_s2 = inlined_call_operand.vmem [shape: f32[4,16], index: 2, kind: input, shape index: {}]   ;;  %s3586_s4 = inlined_call_operand.vmem [shape: bf16[4,128,16], index: 4, kind: output, shape index: {0}]   ;;  %s3587_s6 = inlined_call_operand.vmem [shape: f32[4,128,1], index: 6, kind: output, shape index: {2}]   ;;  %s3588_s5 = inlined_call_operand.vmem [shape: f32[4,128,1], index: 5, kind: output, shape index: {1}]  }
   0x1   :  { %v1987_v0 = vld [vmem:[%s3582_s1] sm:$0xff]   ;;  %v1988_v1 = vld [vmem:[%s3582_s1 + $0x10] sm:$0xff]   ;;  %v1989_v2 = vld [vmem:[%s3582_s1 + $0x8] sm:$0xff]   ;;  %vm335_vm3 = vcmask 7168  }
   0x2   :  { %1907 = vmatprep.subr.bf16.mxu0 %v1987_v0  ;;  %1927 = vmatprep.subr.bf16.mxu1 %v1988_v1  ;;  %v1990_v3 = vld [vmem:[%s3582_s1 + $0x18] sm:$0xff]   ;;  %v21_v4 = vld [vmem:[%s3583_s0] sm:$0xff]  ;;  %v22_v5 = vld [vmem:[%s3583_s0 + $0x8] sm:$0xff]  ;;  %v2134_v33 = vshrl.u32 %v266_v32, 7 }
   0x3   :  { %1908 = vmatpush3.bf16.msra.mxu0 %v1987_v0  ;;  %1928 = vmatpush3.bf16.msra.mxu1 %v1988_v1  ;;  %v23_v6 = vld [vmem:[%s3583_s0 + $0x10] sm:$0xff]  ;;  %v37_v7 = vpack.c.bf16 %v22_v5, %v21_v4  ;;  %v24_v8 = vld [vmem:[%s3583_s0 + $0x18] sm:$0xff]  ;;  %v25_v9 = vld [vmem:[%s3583_s0 + $0x20] sm:$0xff] }
   0x4   :  { %1909 = vmatprep.subr.bf16.mxu0 %v1989_v2  ;;  %1929 = vmatprep.subr.bf16.mxu1 %v1990_v3  ;;  %v26_v10 = vld [vmem:[%s3583_s0 + $0x28] sm:$0xff]  ;;  %v38_v11 = vpack.c.bf16 %v24_v8, %v23_v6  ;;  %v27_v13 = vld [vmem:[%s3583_s0 + $0x30] sm:$0xff]  ;;  %v28_v14 = vld [vmem:[%s3583_s0 + $0x38] sm:$0xff]  ;;  %v268_v34 = vsub.s32 0, %v2134_v33  ;;  %v633_v37 = vsub.s32 1, %v2134_v33 }
   0x5   :  { %1911 = vmatprep.mubr.msk.bf16.mxu0 %vm63_vm0, %v37_v7  ;;  %v39_v12 = vpack.c.bf16 %v26_v10, %v25_v9  ;;  %1931 = vmatprep.mubr.msk.bf16.mxu1 %vm63_vm0, %v37_v7  ;;  %v29_v15 = vld [vmem:[%s3583_s0 + $0x40] sm:$0xff]  ;;  %v30_v16 = vld [vmem:[%s3583_s0 + $0x48] sm:$0xff]  ;;  %v1992_v18 = vld [vmem:[%s3582_s1 + $0x30] sm:$0xff]   ;;  %v40_v21 = vpack.c.bf16 %v28_v14, %v27_v13 }
   0x6   :  { %v1991_v17 = vld [vmem:[%s3582_s1 + $0x20] sm:$0xff]   ;;  %v1993_v19 = vld [vmem:[%s3582_s1 + $0x28] sm:$0xff]   ;;  %v1994_v20 = vld [vmem:[%s3582_s1 + $0x38] sm:$0xff]   ;;  %v41_v22 = vpack.c.bf16 %v30_v16, %v29_v15 }
   0x7   :  { %1910 = vmatpush3.bf16.msra.mxu0 %v1989_v2  ;;  %1930 = vmatpush3.bf16.msra.mxu1 %v1990_v3  ;;  %v31_v23 = vld [vmem:[%s3583_s0 + $0x50] sm:$0xff]  ;;  %v32_v24 = vld [vmem:[%s3583_s0 + $0x58] sm:$0xff]  ;;  %v33_v25 = vld [vmem:[%s3583_s0 + $0x60] sm:$0xff] }
   0x8   :  { %1947 = vmatprep.subr.bf16.mxu0 %v1991_v17  ;;  %1967 = vmatprep.subr.bf16.mxu1 %v1992_v18  ;;  %v34_v26 = vld [vmem:[%s3583_s0 + $0x68] sm:$0xff]  ;;  %v42_v27 = vpack.c.bf16 %v32_v24, %v31_v23  ;;  %v35_v29 = vld [vmem:[%s3583_s0 + $0x70] sm:$0xff]  ;;  %v36_v30 = vld [vmem:[%s3583_s0 + $0x78] sm:$0xff] }
   0x9   :  { %v43_v28 = vpack.c.bf16 %v34_v26, %v33_v25  ;;  %v44_v31 = vpack.c.bf16 %v36_v30, %v35_v29  ;;  %v2140_v35 = vld [vmem:[%s3584_s3] sm:$0xf] }
   0xa   :  { %1912 = vmatmul.mubr.msk.bf16.vlgmr.msra.gmra.mrb[0].mxu0 %vm63_vm0, %v38_v11  ;;  %1932 = vmatmul.mubr.msk.bf16.vlgmr.msra.gmra.mrb[0].mxu1 %vm63_vm0, %v38_v11  ;;  %v2145_v36 = vld [vmem:[%s3585_s2] sm:$0xf]  ;;  %v2149_v38 = vrot.slane %v2140_v35, %v268_v34  ;;  %v2167_v52 = vrot.slane %v2140_v35, %v633_v37 }
   0xb   :  { %1915 = vmatprep.mubr.msk.bf16.mxu0 %vm63_vm0, %v39_v12  ;;  %1935 = vmatprep.mubr.msk.bf16.mxu1 %vm63_vm0, %v39_v12  ;;  %v2152_v39 = vrot.slane %v2145_v36, %v268_v34  ;;  %v2155_v40 = vrot.slane %v2145_v36, %v633_v37 }
   0xc   :  { %1948 = vmatpush3.bf16.msra.mxu0 %v1991_v17  ;;  %1968 = vmatpush3.bf16.msra.mxu1 %v1992_v18 }
   0xd   :  { %1949 = vmatprep.subr.bf16.mxu0 %v1993_v19  ;;  %1969 = vmatprep.subr.bf16.mxu1 %v1994_v20 }
  0x10   :  { %1950 = vmatpush3.bf16.msra.mxu0 %v1993_v19  ;;  %1970 = vmatpush3.bf16.msra.mxu1 %v1994_v20 }
  0x12   :  { %1916 = vmatmul.mubr.msk.bf16.gmra.mrb[4].mxu0 %vm63_vm0, %v40_v21  ;;  %1936 = vmatmul.mubr.msk.bf16.gmra.mrb[4].mxu1 %vm63_vm0, %v40_v21 }
  0x13   :  { %1919 = vmatprep.mubr.msk.bf16.mxu0 %vm63_vm0, %v41_v22  ;;  %1939 = vmatprep.mubr.msk.bf16.mxu1 %vm63_vm0, %v41_v22 }
  0x1a   :  { %1920 = vmatmul.mubr.msk.bf16.gmra.mrb[8].mxu0 %vm63_vm0, %v42_v27  ;;  %1940 = vmatmul.mubr.msk.bf16.gmra.mrb[8].mxu1 %vm63_vm0, %v42_v27 }
  0x1b   :  { %1923 = vmatprep.mubr.msk.bf16.mxu0 %vm63_vm0, %v43_v28  ;;  %1943 = vmatprep.mubr.msk.bf16.mxu1 %vm63_vm0, %v43_v28 }
  0x22   :  { %1924 = vmatmul.mubr.msk.bf16.gmra.mrb[12].mxu0 %vm63_vm0, %v44_v31  ;;  %1944 = vmatmul.mubr.msk.bf16.gmra.mrb[12].mxu1 %vm63_vm0, %v44_v31 }
  0x23   :  { %1951 = vmatprep.mubr.msk.bf16.mxu0 %vm63_vm0, %v37_v7  ;;  %1971 = vmatprep.mubr.msk.bf16.mxu1 %vm63_vm0, %v37_v7 }
  0x2a   :  { %1952 = vmatmul.mubr.msk.bf16.vlgmr.msra.gmra.mrb[16].mxu0 %vm63_vm0, %v38_v11  ;;  %1972 = vmatmul.mubr.msk.bf16.vlgmr.msra.gmra.mrb[16].mxu1 %vm63_vm0, %v38_v11 }
  0x2b   :  { %1955 = vmatprep.mubr.msk.bf16.mxu0 %vm63_vm0, %v39_v12  ;;  %1975 = vmatprep.mubr.msk.bf16.mxu1 %vm63_vm0, %v39_v12 }
  0x32   :  { %1956 = vmatmul.mubr.msk.bf16.gmra.mrb[20].mxu0 %vm63_vm0, %v40_v21  ;;  %1976 = vmatmul.mubr.msk.bf16.gmra.mrb[20].mxu1 %vm63_vm0, %v40_v21 }
  0x33   :  { %1959 = vmatprep.mubr.msk.bf16.mxu0 %vm63_vm0, %v41_v22  ;;  %1979 = vmatprep.mubr.msk.bf16.mxu1 %vm63_vm0, %v41_v22 }
  0x3a   :  { %1960 = vmatmul.mubr.msk.bf16.gmra.mrb[24].mxu0 %vm63_vm0, %v42_v27  ;;  %1980 = vmatmul.mubr.msk.bf16.gmra.mrb[24].mxu1 %vm63_vm0, %v42_v27 }
  0x3b   :  { %1963 = vmatprep.mubr.msk.bf16.mxu0 %vm63_vm0, %v43_v28  ;;  %1983 = vmatprep.mubr.msk.bf16.mxu1 %vm63_vm0, %v43_v28 }
  0x42   :  { %1964 = vmatmul.mubr.msk.bf16.gmra.mrb[28].mxu0 %vm63_vm0, %v44_v31  ;;  %1984 = vmatmul.mubr.msk.bf16.gmra.mrb[28].mxu1 %vm63_vm0, %v44_v31 }
  0xdd   :  { %v1913_v41 = vpop.f32.mrb[0].mxu0  ;;  %v1933_v44 = vpop.f32.mrb[0].mxu1 }
  0xde   :  { %v1805_v42 = vpack.c.bf16 %v1913_v41, %v1913_v41  ;;  %v2157_v43 = vpop.f32.mrb[1].mxu0  ;;  %v358_v45 = vmul.f32 %v1913_v41, %v2149_v38  ;;  %v272_v46 = vmul.f32 %v1913_v41, %v2152_v39  ;;  %v1821_v48 = vpack.c.bf16 %v1933_v44, %v1933_v44  ;;  %v2163_v50 = vpop.f32.mrb[1].mxu1 }
  0xdf   :  { %v1803_v47 = vpack.c.bf16 %v2157_v43, %v2157_v43  ;;  %v1914_v49 = vpop.f32.mrb[2].mxu0  ;;  %v637_v51 = vmul.f32 %v1933_v44, %v2155_v40  ;;  %v1819_v54 = vpack.c.bf16 %v2163_v50, %v2163_v50  ;;  %v1934_v56 = vpop.f32.mrb[2].mxu1  ;;  %v722_v1 = vmul.f32 %v1933_v44, %v2167_v52 }
  0xe0   :  { %252 = vst.msk [vmem:[%s3586_s4 + $0x8] sm:$0xf] %vm249_vm1, %v1805_v42  ;;  %v1806_v53 = vpack.c.bf16 %v1914_v49, %v1914_v49  ;;  %v2175_v55 = vpop.f32.mrb[3].mxu0  ;;  %v378_v57 = vsel %vm286_vm2, %v358_v45, 0.0  ;;  %v293_v58 = vsel %vm286_vm2, %v272_v46, 0.0  ;;  %v1822_v60 = vpack.c.bf16 %v1934_v56, %v1934_v56  ;;  %v2189_v61 = vpop.f32.mrb[3].mxu1 }
  0xe1   :  { %250 = vst.msk [vmem:[%s3586_s4] sm:$0xf] %vm249_vm1, %v1803_v47  ;;  %1601 = vst.msk [vmem:[%s3586_s4 + $0x48] sm:$0xf] %vm249_vm1, %v1821_v48  ;;  %v1804_v59 = vpack.c.bf16 %v2175_v55, %v2175_v55  ;;  %379 = vadd.xlane.f32.xlu0 %v378_v57  ;;  %294 = vadd.xlane.f32.xlu1 %v293_v58  ;;  %v273_v62 = vmul.f32 %v1914_v49, %v2152_v39  ;;  %v657_v0 = vsel %vm286_vm2, %v637_v51, 0.0 }
  0xe2   :  { %253 = vst.msk [vmem:[%s3586_s4 + $0xc] sm:$0xf] %vm249_vm1, %v1806_v53  ;;  %1599 = vst.msk [vmem:[%s3586_s4 + $0x40] sm:$0xf] %vm249_vm1, %v1819_v54  ;;  %v1820_v63 = vpack.c.bf16 %v2189_v61, %v2189_v61  ;;  %v359_v3 = vmul.f32 %v1914_v49, %v2149_v38  ;;  %v742_v8 = vsel %vm286_vm2, %v722_v1, 0.0  ;;  %v270_v9 = vmul.f32 %v2152_v39, %v2157_v43 }
  0xe3   :  { %251 = vst.msk [vmem:[%s3586_s4 + $0x4] sm:$0xf] %vm249_vm1, %v1804_v59  ;;  %1602 = vst.msk [vmem:[%s3586_s4 + $0x4c] sm:$0xf] %vm249_vm1, %v1822_v60  ;;  %v296_v2 = vsel %vm286_vm2, %v273_v62, 0.0  ;;  %v638_v10 = vmul.f32 %v1934_v56, %v2155_v40  ;;  %v356_v26 = vmul.f32 %v2149_v38, %v2157_v43  ;;  %v723_v27 = vmul.f32 %v1934_v56, %v2167_v52 }
  0xe4   :  { %1600 = vst.msk [vmem:[%s3586_s4 + $0x44] sm:$0xf] %vm249_vm1, %v1820_v63  ;;  %v381_v14 = vsel %vm286_vm2, %v359_v3, 0.0  ;;  %v287_v24 = vsel %vm286_vm2, %v270_v9, 0.0  ;;  %v635_v29 = vmul.f32 %v2155_v40, %v2163_v50  ;;  %v357_v43 = vmul.f32 %v2149_v38, %v2175_v55 }
  0xe5   :  { %658 = vadd.xlane.f32.xlu0 %v657_v0  ;;  %297 = vadd.xlane.f32.xlu1 %v296_v2  ;;  %v2218_v4 = vpop.f32.mrb[4].mxu0  ;;  %v2224_v7 = vpop.f32.mrb[4].mxu1  ;;  %v660_v25 = vsel %vm286_vm2, %v638_v10, 0.0  ;;  %v372_v41 = vsel %vm286_vm2, %v356_v26, 0.0  ;;  %v745_v42 = vsel %vm286_vm2, %v723_v27, 0.0  ;;  %v720_v53 = vmul.f32 %v2167_v52, %v2163_v50 }
  0xe6   :  { %v1809_v5 = vpack.c.bf16 %v2218_v4, %v2218_v4  ;;  %v2222_v6 = vpop.f32.mrb[5].mxu0  ;;  %v2234_v13 = vpop.f32.mrb[5].mxu1  ;;  %v1825_v17 = vpack.c.bf16 %v2224_v7, %v2224_v7  ;;  %v651_v51 = vsel %vm286_vm2, %v635_v29, 0.0  ;;  %v375_v59 = vsel %vm286_vm2, %v357_v43, 0.0 }
  0xe7   :  { %v1807_v11 = vpack.c.bf16 %v2222_v6, %v2222_v6  ;;  %v2232_v12 = vpop.f32.mrb[6].mxu0  ;;  %v1823_v18 = vpack.c.bf16 %v2234_v13, %v2234_v13  ;;  %v2249_v19 = vpop.f32.mrb[6].mxu1  ;;  %v636_v60 = vmul.f32 %v2155_v40, %v2189_v61  ;;  %v721_v3 = vmul.f32 %v2167_v52, %v2189_v61 }
  0xe8   :  { %256 = vst.msk [vmem:[%s3586_s4 + $0x18] sm:$0xf] %vm249_vm1, %v1809_v5  ;;  %v1810_v15 = vpack.c.bf16 %v2232_v12, %v2232_v12  ;;  %v2243_v16 = vpop.f32.mrb[7].mxu0  ;;  %v2257_v21 = vpop.f32.mrb[7].mxu1  ;;  %1605 = vst.msk [vmem:[%s3586_s4 + $0x58] sm:$0xf] %vm249_vm1, %v1825_v17  ;;  %v1826_v22 = vpack.c.bf16 %v2249_v19, %v2249_v19 }
  0xe9   :  { %743 = vadd.xlane.f32.xlu0 %v742_v8  ;;  %382 = vadd.xlane.f32.xlu1 %v381_v14  ;;  %254 = vst.msk [vmem:[%s3586_s4 + $0x10] sm:$0xf] %vm249_vm1, %v1807_v11  ;;  %v1808_v20 = vpack.c.bf16 %v2243_v16, %v2243_v16  ;;  %1603 = vst.msk [vmem:[%s3586_s4 + $0x50] sm:$0xf] %vm249_vm1, %v1823_v18  ;;  %v1824_v23 = vpack.c.bf16 %v2257_v21, %v2257_v21  ;;  %v736_v18 = vsel %vm286_vm2, %v720_v53, 0.0 }
  0xea   :  { %257 = vst.msk [vmem:[%s3586_s4 + $0x1c] sm:$0xf] %vm249_vm1, %v1810_v15  ;;  %1606 = vst.msk [vmem:[%s3586_s4 + $0x5c] sm:$0xf] %vm249_vm1, %v1826_v22  ;;  %v271_v22 = vmul.f32 %v2152_v39, %v2175_v55  ;;  %v739_v29 = vsel %vm286_vm2, %v721_v3, 0.0 }
  0xeb   :  { %255 = vst.msk [vmem:[%s3586_s4 + $0x14] sm:$0xf] %vm249_vm1, %v1808_v20  ;;  %1604 = vst.msk [vmem:[%s3586_s4 + $0x54] sm:$0xf] %vm249_vm1, %v1824_v23  ;;  %v654_v20 = vsel %vm286_vm2, %v636_v60, 0.0 }
  0xec   :  { %v290_v43 = vsel %vm286_vm2, %v271_v22, 0.0 }
  0xed   :  { %288 = vadd.xlane.f32.xlu0 %v287_v24  ;;  %661 = vadd.xlane.f32.xlu1 %v660_v25  ;;  %v1921_v28 = vpop.f32.mrb[8].mxu0  ;;  %v1941_v31 = vpop.f32.mrb[8].mxu1 }
  0xee   :  { %v154_v30 = vpop.f32.mrb[9].mxu0  ;;  %v1813_v32 = vpack.c.bf16 %v1921_v28, %v1921_v28  ;;  %v2294_v37 = vpop.f32.mrb[9].mxu1  ;;  %v1829_v54 = vpack.c.bf16 %v1941_v31, %v1941_v31  ;;  %v2322_v50 = vmul.f32 %v1921_v28, %v2152_v39  ;;  %v2335_v63 = vmul.f32 %v1921_v28, %v2149_v38 }
  0xef   :  { %v1922_v34 = vpop.f32.mrb[10].mxu0  ;;  %v1811_v44 = vpack.c.bf16 %v154_v30, %v154_v30  ;;  %v1942_v46 = vpop.f32.mrb[10].mxu1  ;;  %v1827_v56 = vpack.c.bf16 %v2294_v37, %v2294_v37  ;;  %v2349_v1 = vmul.f32 %v1941_v31, %v2155_v40  ;;  %v2361_v8 = vmul.f32 %v1941_v31, %v2167_v52 }
  0xf0   :  { %v157_v45 = vpop.f32.mrb[11].mxu0  ;;  %260 = vst.msk [vmem:[%s3586_s4 + $0x28] sm:$0xf] %vm249_vm1, %v1813_v32  ;;  %v1814_v47 = vpack.c.bf16 %v1922_v34, %v1922_v34  ;;  %v522_v49 = vpop.f32.mrb[11].mxu1  ;;  %v2325_v57 = vmul.f32 %v1922_v34, %v2152_v39  ;;  %v1830_v58 = vpack.c.bf16 %v1942_v46, %v1942_v46  ;;  %1609 = vst.msk [vmem:[%s3586_s4 + $0x68] sm:$0xf] %vm249_vm1, %v1829_v54 }
  0xf1   :  { %373 = vadd.xlane.f32.xlu0 %v372_v41  ;;  %746 = vadd.xlane.f32.xlu1 %v745_v42  ;;  %v1812_v48 = vpack.c.bf16 %v157_v45, %v157_v45  ;;  %258 = vst.msk [vmem:[%s3586_s4 + $0x20] sm:$0xf] %vm249_vm1, %v1811_v44  ;;  %v1828_v62 = vpack.c.bf16 %v522_v49, %v522_v49  ;;  %1607 = vst.msk [vmem:[%s3586_s4 + $0x60] sm:$0xf] %vm249_vm1, %v1827_v56 }
  0xf2   :  { %261 = vst.msk [vmem:[%s3586_s4 + $0x2c] sm:$0xf] %vm249_vm1, %v1814_v47  ;;  %1610 = vst.msk [vmem:[%s3586_s4 + $0x6c] sm:$0xf] %vm249_vm1, %v1830_v58  ;;  %v2346_v0 = vmul.f32 %v1922_v34, %v2149_v38  ;;  %v2358_v5 = vmul.f32 %v1942_v46, %v2155_v40  ;;  %v2364_v9 = vmul.f32 %v1942_v46, %v2167_v52 }
  0xf3   :  { %259 = vst.msk [vmem:[%s3586_s4 + $0x24] sm:$0xf] %vm249_vm1, %v1812_v48  ;;  %1608 = vst.msk [vmem:[%s3586_s4 + $0x64] sm:$0xf] %vm249_vm1, %v1828_v62  ;;  %v2369_v14 = vmul.f32 %v2152_v39, %v154_v30  ;;  %v2372_v61 = vmul.f32 %v2152_v39, %v157_v45  ;;  %v2381_v23 = vmul.f32 %v2149_v38, %v154_v30 }
  0xf4   :  { %v2384_v26 = vmul.f32 %v2149_v38, %v157_v45  ;;  %v2391_v31 = vmul.f32 %v2155_v40, %v2294_v37  ;;  %v2394_v55 = vmul.f32 %v2155_v40, %v522_v49  ;;  %v276_v32 = vmul.f32 %v2218_v4, %v2152_v39 }
  0xf5   :  { %652 = vadd.xlane.f32.xlu0 %v651_v51  ;;  %376 = vadd.xlane.f32.xlu1 %v375_v59  ;;  %v1925_v2 = vpop.f32.mrb[12].mxu0  ;;  %v1945_v11 = vpop.f32.mrb[12].mxu1  ;;  %v2406_v42 = vmul.f32 %v2167_v52, %v2294_v37  ;;  %v277_v44 = vmul.f32 %v2232_v12, %v2152_v39  ;;  %v2416_v45 = vmul.f32 %v2167_v52, %v522_v49 }
  0xf6   :  { %v2366_v10 = vpop.f32.mrb[13].mxu0  ;;  %v2374_v17 = vpop.f32.mrb[13].mxu1  ;;  %v1817_v27 = vpack.c.bf16 %v1925_v2, %v1925_v2  ;;  %v1833_v46 = vpack.c.bf16 %v1945_v11, %v1945_v11  ;;  %v2429_v47 = vmul.f32 %v1925_v2, %v2152_v39  ;;  %v362_v51 = vmul.f32 %v2218_v4, %v2149_v38 }
  0xf7   :  { %v1926_v15 = vpop.f32.mrb[14].mxu0  ;;  %v1946_v25 = vpop.f32.mrb[14].mxu1  ;;  %v1815_v30 = vpack.c.bf16 %v2366_v10, %v2366_v10  ;;  %v1831_v37 = vpack.c.bf16 %v2374_v17, %v2374_v17  ;;  %v2445_v56 = vmul.f32 %v1925_v2, %v2149_v38  ;;  %v305_v60 = vsel %vm286_vm2, %v276_v32, 0.0 }
  0xf8   :  { %v173_v24 = vpop.f32.mrb[15].mxu0  ;;  %v2386_v28 = vpop.f32.mrb[15].mxu1  ;;  %264 = vst.msk [vmem:[%s3586_s4 + $0x38] sm:$0xf] %vm249_vm1, %v1817_v27  ;;  %v1818_v34 = vpack.c.bf16 %v1926_v15, %v1926_v15  ;;  %v2432_v48 = vmul.f32 %v1926_v15, %v2152_v39  ;;  %1613 = vst.msk [vmem:[%s3586_s4 + $0x78] sm:$0xf] %vm249_vm1, %v1833_v46  ;;  %v1834_v53 = vpack.c.bf16 %v1946_v25, %v1946_v25 }
  0xf9   :  { %737 = vadd.xlane.f32.xlu0 %v736_v18  ;;  %655 = vadd.xlane.f32.xlu1 %v654_v20  ;;  %v1816_v41 = vpack.c.bf16 %v173_v24, %v173_v24  ;;  %262 = vst.msk [vmem:[%s3586_s4 + $0x30] sm:$0xf] %vm249_vm1, %v1815_v30  ;;  %v1832_v54 = vpack.c.bf16 %v2386_v28, %v2386_v28  ;;  %1611 = vst.msk [vmem:[%s3586_s4 + $0x70] sm:$0xf] %vm249_vm1, %v1831_v37  ;;  %v308_v20 = vsel %vm286_vm2, %v277_v44, 0.0 }
  0xfa   :  { %265 = vst.msk [vmem:[%s3586_s4 + $0x3c] sm:$0xf] %vm249_vm1, %v1818_v34  ;;  %v363_v4 = vmul.f32 %v2232_v12, %v2149_v38  ;;  %v2459_v62 = vmul.f32 %v1926_v15, %v2149_v38  ;;  %v2462_v2 = vmul.f32 %v1945_v11, %v2155_v40  ;;  %1614 = vst.msk [vmem:[%s3586_s4 + $0x7c] sm:$0xf] %vm249_vm1, %v1834_v53 }
  0xfb   :  { %263 = vst.msk [vmem:[%s3586_s4 + $0x34] sm:$0xf] %vm249_vm1, %v1816_v41  ;;  %1612 = vst.msk [vmem:[%s3586_s4 + $0x74] sm:$0xf] %vm249_vm1, %v1832_v54  ;;  %v2478_v12 = vmul.f32 %v1946_v25, %v2155_v40  ;;  %v2481_v15 = vmul.f32 %v1945_v11, %v2167_v52  ;;  %v2484_v22 = vmul.f32 %v1946_v25, %v2167_v52  ;;  %v390_v41 = vsel %vm286_vm2, %v362_v51, 0.0 }
  0xfc   :  { %v2492_v30 = vmul.f32 %v2152_v39, %v2366_v10  ;;  %v2495_v32 = vmul.f32 %v2152_v39, %v173_v24  ;;  %v641_v11 = vmul.f32 %v2224_v7, %v2155_v40  ;;  %v2503_v25 = vmul.f32 %v2149_v38, %v2366_v10 }
  0xfd   :  { %740 = vadd.xlane.f32.xlu1 %v739_v29  ;;  %291 = vadd.xlane.f32.xlu0 %v290_v43  ;;  %v2434_v49 = vpop.f32.mrb[16].mxu0  ;;  %v2449_v59 = vpop.f32.mrb[16].mxu1  ;;  %v642_v43 = vmul.f32 %v2249_v19, %v2155_v40  ;;  %v2509_v44 = vmul.f32 %v2149_v38, %v173_v24  ;;  %v393_v37 = vsel %vm286_vm2, %v363_v4, 0.0  ;;  %v2516_v53 = vmul.f32 %v2155_v40, %v2374_v17 }
  0xfe   :  { %v2447_v58 = vpop.f32.mrb[17].mxu0  ;;  %3600 = vst [vmem:[#allocation3_spill] sm:$0xff] %v2449_v59  ;;  %v2466_v18 = vpop.f32.mrb[17].mxu1  ;;  %v1837_v46 = vpack.c.bf16 %v2434_v49, %v2434_v49  ;;  %v2522_v51 = vmul.f32 %v2155_v40, %v2386_v28 }
  0xff   :  { %3599 = vst [vmem:[#allocation2_spill] sm:$0xff] %v2447_v58  ;;  %v2464_v3 = vpop.f32.mrb[18].mxu0  ;;  %3601 = vst [vmem:[#allocation4_spill] sm:$0xff] %v2466_v18  ;;  %v2488_v29 = vpop.f32.mrb[18].mxu1  ;;  %v1835_v10 = vpack.c.bf16 %v2447_v58, %v2447_v58 }
 0x100   :  { %v2486_v27 = vpop.f32.mrb[19].mxu0  ;;  %3603 = vst [vmem:[#allocation6_spill] sm:$0xff] %v2488_v29  ;;  %v2497_v34 = vpop.f32.mrb[19].mxu1  ;;  %1679 = vst.msk [vmem:[%s3586_s4 + $0x88] sm:$0xf] %vm249_vm1, %v1837_v46  ;;  %v1838_v24 = vpack.c.bf16 %v2464_v3, %v2464_v3 }
 0x101   :  { %3602 = vst [vmem:[#allocation5_spill] sm:$0xff] %v2486_v27  ;;  %306 = vadd.xlane.f32.xlu0 %v305_v60  ;;  %309 = vadd.xlane.f32.xlu1 %v308_v20  ;;  %v1836_v54 = vpack.c.bf16 %v2486_v27, %v2486_v27  ;;  %v2534_v60 = vmul.f32 %v2167_v52, %v2374_v17  ;;  %1677 = vst.msk [vmem:[%s3586_s4 + $0x80] sm:$0xf] %vm249_vm1, %v1835_v10 }
 0x102   :  { %v2544_v20 = vmul.f32 %v2167_v52, %v2386_v28  ;;  %v726_v17 = vmul.f32 %v2224_v7, %v2167_v52  ;;  %1680 = vst.msk [vmem:[%s3586_s4 + $0x8c] sm:$0xf] %vm249_vm1, %v1838_v24  ;;  %v1851_v28 = vpack.c.bf16 %v2466_v18, %v2466_v18  ;;  %v1854_v10 = vpack.c.bf16 %v2488_v29, %v2488_v29 }
 0x103   :  { %1678 = vst.msk [vmem:[%s3586_s4 + $0x84] sm:$0xf] %vm249_vm1, %v1836_v54  ;;  %v669_v7 = vsel %vm286_vm2, %v641_v11, 0.0  ;;  %v727_v24 = vmul.f32 %v2249_v19, %v2167_v52  ;;  %v1852_v54 = vpack.c.bf16 %v2497_v34, %v2497_v34 }
 0x104   :  { %1755 = vst.msk [vmem:[%s3586_s4 + $0xc0] sm:$0xf] %vm249_vm1, %v1851_v28  ;;  %1758 = vst.msk [vmem:[%s3586_s4 + $0xcc] sm:$0xf] %vm249_vm1, %v1854_v10  ;;  %v754_v11 = vsel %vm286_vm2, %v726_v17, 0.0  ;;  %v361_v17 = vmul.f32 %v2149_v38, %v2243_v16 }
 0x105   :  { %391 = vadd.xlane.f32.xlu0 %v390_v41  ;;  %394 = vadd.xlane.f32.xlu1 %v393_v37  ;;  %v2536_v4 = vpop.f32.mrb[20].mxu0  ;;  %v1853_v41 = vpack.c.bf16 %v2449_v59, %v2449_v59  ;;  %v2550_v37 = vpop.f32.mrb[20].mxu1  ;;  %v672_v59 = vsel %vm286_vm2, %v642_v43, 0.0  ;;  %1756 = vst.msk [vmem:[%s3586_s4 + $0xc4] sm:$0xf] %vm249_vm1, %v1852_v54  ;;  %v757_v43 = vsel %vm286_vm2, %v727_v24, 0.0 }
 0x106   :  { %v2548_v46 = vpop.f32.mrb[21].mxu0  ;;  %v2568_v58 = vpop.f32.mrb[21].mxu1  ;;  %v1841_v28 = vpack.c.bf16 %v2536_v4, %v2536_v4 }
 0x107   :  { %v2566_v27 = vpop.f32.mrb[22].mxu0  ;;  %1757 = vst.msk [vmem:[%s3586_s4 + $0xc8] sm:$0xf] %vm249_vm1, %v1853_v41  ;;  %v2582_v29 = vpop.f32.mrb[22].mxu1  ;;  %v275_v41 = vmul.f32 %v2152_v39, %v2243_v16  ;;  %v1855_v16 = vpack.c.bf16 %v2568_v58, %v2568_v58 }
 0x108   :  { %v2580_v18 = vpop.f32.mrb[23].mxu0  ;;  %v2592_v19 = vpop.f32.mrb[23].mxu1  ;;  %1683 = vst.msk [vmem:[%s3586_s4 + $0x98] sm:$0xf] %vm249_vm1, %v1841_v28  ;;  %v1842_v24 = vpack.c.bf16 %v2566_v27, %v2566_v27  ;;  %v387_v28 = vsel %vm286_vm2, %v361_v17, 0.0 }
 0x109   :  { %670 = vadd.xlane.f32.xlu0 %v669_v7  ;;  %673 = vadd.xlane.f32.xlu1 %v672_v59  ;;  %v274_v59 = vmul.f32 %v2152_v39, %v2222_v6  ;;  %v360_v7 = vmul.f32 %v2149_v38, %v2222_v6  ;;  %v302_v54 = vsel %vm286_vm2, %v275_v41, 0.0  ;;  %v1839_v39 = vpack.c.bf16 %v2548_v46, %v2548_v46 }
 0x10a   :  { %v1840_v6 = vpack.c.bf16 %v2580_v18, %v2580_v18  ;;  %1684 = vst.msk [vmem:[%s3586_s4 + $0x9c] sm:$0xf] %vm249_vm1, %v1842_v24  ;;  %v1857_v38 = vpack.c.bf16 %v2550_v37, %v2550_v37  ;;  %1759 = vst.msk [vmem:[%s3586_s4 + $0xd0] sm:$0xf] %vm249_vm1, %v1855_v16  ;;  %v724_v24 = vmul.f32 %v2167_v52, %v2234_v13 }
 0x10b   :  { %v299_v10 = vsel %vm286_vm2, %v274_v59, 0.0  ;;  %1681 = vst.msk [vmem:[%s3586_s4 + $0x90] sm:$0xf] %vm249_vm1, %v1839_v39  ;;  %v639_v59 = vmul.f32 %v2155_v40, %v2234_v13  ;;  %v384_v41 = vsel %vm286_vm2, %v360_v7, 0.0 }
 0x10c   :  { %1682 = vst.msk [vmem:[%s3586_s4 + $0x94] sm:$0xf] %vm249_vm1, %v1840_v6  ;;  %1761 = vst.msk [vmem:[%s3586_s4 + $0xd8] sm:$0xf] %vm249_vm1, %v1857_v38  ;;  %v725_v6 = vmul.f32 %v2167_v52, %v2257_v21 }
 0x10d   :  { %755 = vadd.xlane.f32.xlu0 %v754_v11  ;;  %758 = vadd.xlane.f32.xlu1 %v757_v43  ;;  %v998_v11 = vsub.s32 2, %v2134_v33  ;;  %v1858_v43 = vpack.c.bf16 %v2582_v29, %v2582_v29  ;;  %v1961_v17 = vpop.f32.mrb[24].mxu0 }
 0x10e   :  { %v1845_v16 = vpack.c.bf16 %v1961_v17, %v1961_v17 }
 0x10f   :  { %1762 = vst.msk [vmem:[%s3586_s4 + $0xdc] sm:$0xf] %vm249_vm1, %v1858_v43  ;;  %v2667_v7 = vrot.slane %v2140_v35, %v998_v11  ;;  %v2675_v38 = vrot.slane %v2145_v36, %v998_v11  ;;  %v884_v43 = vpop.f32.mrb[25].mxu0  ;;  %v751_v11 = vsel %vm286_vm2, %v725_v6, 0.0 }
 0x110   :  { %1687 = vst.msk [vmem:[%s3586_s4 + $0xa8] sm:$0xf] %vm249_vm1, %v1845_v16  ;;  %v1962_v13 = vpop.f32.mrb[26].mxu0 }
 0x111   :  { %300 = vadd.xlane.f32.xlu0 %v299_v10  ;;  %303 = vadd.xlane.f32.xlu1 %v302_v54  ;;  %v640_v10 = vmul.f32 %v2155_v40, %v2257_v21  ;;  %v1856_v54 = vpack.c.bf16 %v2592_v19, %v2592_v19  ;;  %v663_v40 = vsel %vm286_vm2, %v639_v59, 0.0  ;;  %v2678_v59 = vmul.f32 %v1961_v17, %v2667_v7 }
 0x112   :  { %v2689_v52 = vmul.f32 %v2667_v7, %v884_v43  ;;  %v748_v21 = vsel %vm286_vm2, %v724_v24, 0.0 }
 0x113   :  { %1760 = vst.msk [vmem:[%s3586_s4 + $0xd4] sm:$0xf] %vm249_vm1, %v1856_v54  ;;  %v666_v39 = vsel %vm286_vm2, %v640_v10, 0.0  ;;  %v2682_v10 = vmul.f32 %v2675_v38, %v884_v43  ;;  %v2698_v54 = vmul.f32 %v1962_v13, %v2667_v7 }
 0x115   :  { %385 = vadd.xlane.f32.xlu0 %v384_v41  ;;  %388 = vadd.xlane.f32.xlu1 %v387_v28  ;;  %v1363_v41 = vsub.s32 3, %v2134_v33  ;;  %v1843_v28 = vpack.c.bf16 %v884_v43, %v884_v43  ;;  %v1846_v33 = vpack.c.bf16 %v1962_v13, %v1962_v13 }
 0x117   :  { %1685 = vst.msk [vmem:[%s3586_s4 + $0xa0] sm:$0xf] %vm249_vm1, %v1843_v28  ;;  %v2707_v6 = vrot.slane %v2145_v36, %v1363_v41  ;;  %v2710_v43 = vrot.slane %v2140_v35, %v1363_v41  ;;  %1688 = vst.msk [vmem:[%s3586_s4 + $0xac] sm:$0xf] %vm249_vm1, %v1846_v33  ;;  %v317_v28 = vsel %vm286_vm2, %v2322_v50, 0.0  ;;  %v2723_v36 = vmul.f32 %v1961_v17, %v2675_v38 }
 0x118   :  { %v320_v35 = vsel %vm286_vm2, %v2325_v57, 0.0  ;;  %v2744_v57 = vmul.f32 %v1962_v13, %v2675_v38  ;;  %v405_v13 = vsel %vm286_vm2, %v2346_v0, 0.0  ;;  %v681_v0 = vsel %vm286_vm2, %v2349_v1, 0.0 }
 0x119   :  { %664 = vadd.xlane.f32.xlu0 %v663_v40  ;;  %667 = vadd.xlane.f32.xlu1 %v666_v39  ;;  %v887_v40 = vpop.f32.mrb[27].mxu0  ;;  %v396_v1 = vsel %vm286_vm2, %v2381_v23, 0.0 }
 0x11a   :  { %v1844_v39 = vpack.c.bf16 %v887_v40, %v887_v40  ;;  %v2701_v16 = vmul.f32 %v2675_v38, %v887_v40  ;;  %v2704_v24 = vmul.f32 %v2667_v7, %v887_v40 }
 0x11c   :  { %3604 = vst [vmem:[#allocation7_spill] sm:$0xff] %v2704_v24  ;;  %1686 = vst.msk [vmem:[%s3586_s4 + $0xa4] sm:$0xf] %vm249_vm1, %v1844_v39 }
 0x11d   :  { %749 = vadd.xlane.f32.xlu0 %v748_v21  ;;  %752 = vadd.xlane.f32.xlu1 %v751_v11  ;;  %v1981_v21 = vpop.f32.mrb[24].mxu1 }
 0x11e   :  { %v1861_v41 = vpack.c.bf16 %v1981_v21, %v1981_v21  ;;  %v2728_v11 = vmul.f32 %v1981_v21, %v2707_v6  ;;  %v2731_v33 = vmul.f32 %v1981_v21, %v2710_v43  ;;  %v1249_v50 = vpop.f32.mrb[25].mxu1 }
 0x11f   :  { %v1859_v40 = vpack.c.bf16 %v1249_v50, %v1249_v50  ;;  %v2734_v39 = vmul.f32 %v2707_v6, %v1249_v50  ;;  %v2737_v17 = vmul.f32 %v2710_v43, %v1249_v50  ;;  %v1982_v24 = vpop.f32.mrb[26].mxu1  ;;  %v402_v50 = vsel %vm286_vm2, %v2335_v63, 0.0 }
 0x120   :  { %1765 = vst.msk [vmem:[%s3586_s4 + $0xe8] sm:$0xf] %vm249_vm1, %v1861_v41  ;;  %v1862_v21 = vpack.c.bf16 %v1982_v24, %v1982_v24 }
 0x121   :  { %318 = vadd.xlane.f32.xlu0 %v317_v28  ;;  %321 = vadd.xlane.f32.xlu1 %v320_v35  ;;  %3605 = vst [vmem:[#allocation8_spill] sm:$0xff] %v2737_v17  ;;  %v2747_v28 = vmul.f32 %v1982_v24, %v2707_v6  ;;  %v2750_v35 = vmul.f32 %v1982_v24, %v2710_v43  ;;  %1763 = vst.msk [vmem:[%s3586_s4 + $0xe0] sm:$0xf] %vm249_vm1, %v1859_v40  ;;  %v1252_v17 = vpop.f32.mrb[27].mxu1  ;;  %v684_v40 = vsel %vm286_vm2, %v2358_v5, 0.0 }
 0x122   :  { %1766 = vst.msk [vmem:[%s3586_s4 + $0xec] sm:$0xf] %vm249_vm1, %v1862_v21  ;;  %v1860_v41 = vpack.c.bf16 %v1252_v17, %v1252_v17  ;;  %v2765_v24 = vmul.f32 %v2707_v6, %v1252_v17  ;;  %v2768_v63 = vmul.f32 %v2710_v43, %v1252_v17  ;;  %v766_v21 = vsel %vm286_vm2, %v2361_v8, 0.0 }
 0x123   :  { %v769_v17 = vsel %vm286_vm2, %v2364_v9, 0.0  ;;  %v399_v5 = vsel %vm286_vm2, %v2384_v26, 0.0  ;;  %v675_v8 = vsel %vm286_vm2, %v2391_v31, 0.0  ;;  %v1965_v9 = vpop.f32.mrb[28].mxu0 }
 0x124   :  { %1764 = vst.msk [vmem:[%s3586_s4 + $0xe4] sm:$0xf] %vm249_vm1, %v1860_v41  ;;  %v1849_v41 = vpack.c.bf16 %v1965_v9, %v1965_v9  ;;  %v900_v23 = vpop.f32.mrb[29].mxu0 }
 0x125   :  { %403 = vadd.xlane.f32.xlu0 %v402_v50  ;;  %406 = vadd.xlane.f32.xlu1 %v405_v13  ;;  %v311_v50 = vsel %vm286_vm2, %v2369_v14, 0.0  ;;  %v314_v13 = vsel %vm286_vm2, %v2372_v61, 0.0  ;;  %v678_v14 = vsel %vm286_vm2, %v2394_v55, 0.0  ;;  %v2795_v61 = vmul.f32 %v1965_v9, %v2675_v38 }
 0x126   :  { %1691 = vst.msk [vmem:[%s3586_s4 + $0xb8] sm:$0xf] %vm249_vm1, %v1849_v41  ;;  %v1847_v26 = vpack.c.bf16 %v900_v23, %v900_v23  ;;  %v2805_v31 = vmul.f32 %v2675_v38, %v900_v23  ;;  %v2808_v55 = vmul.f32 %v2667_v7, %v900_v23  ;;  %v332_v41 = vsel %vm286_vm2, %v2432_v48, 0.0 }
 0x128   :  { %1689 = vst.msk [vmem:[%s3586_s4 + $0xb0] sm:$0xf] %vm249_vm1, %v1847_v26 }
 0x129   :  { %682 = vadd.xlane.f32.xlu0 %v681_v0  ;;  %685 = vadd.xlane.f32.xlu1 %v684_v40  ;;  %v2798_v0 = vmul.f32 %v1965_v9, %v2667_v7  ;;  %v760_v40 = vsel %vm286_vm2, %v2406_v42, 0.0  ;;  %v329_v9 = vsel %vm286_vm2, %v2429_v47, 0.0 }
 0x12d   :  { %767 = vadd.xlane.f32.xlu0 %v766_v21  ;;  %770 = vadd.xlane.f32.xlu1 %v769_v17  ;;  %v1966_v21 = vpop.f32.mrb[30].mxu0  ;;  %v763_v17 = vsel %vm286_vm2, %v2416_v45, 0.0 }
 0x131   :  { %312 = vadd.xlane.f32.xlu0 %v311_v50  ;;  %315 = vadd.xlane.f32.xlu1 %v314_v13  ;;  %v1850_v50 = vpack.c.bf16 %v1966_v21, %v1966_v21  ;;  %v2819_v13 = vmul.f32 %v1966_v21, %v2675_v38 }
 0x133   :  { %1692 = vst.msk [vmem:[%s3586_s4 + $0xbc] sm:$0xf] %vm249_vm1, %v1850_v50 }
 0x135   :  { %397 = vadd.xlane.f32.xlu0 %v396_v1  ;;  %400 = vadd.xlane.f32.xlu1 %v399_v5  ;;  %v2822_v1 = vmul.f32 %v1966_v21, %v2667_v7  ;;  %v903_v5 = vpop.f32.mrb[31].mxu0 }
 0x136   :  { %v1848_v42 = vpack.c.bf16 %v903_v5, %v903_v5  ;;  %v2828_v45 = vmul.f32 %v2667_v7, %v903_v5 }
 0x138   :  { %1690 = vst.msk [vmem:[%s3586_s4 + $0xb4] sm:$0xf] %vm249_vm1, %v1848_v42 }
 0x139   :  { %676 = vadd.xlane.f32.xlu0 %v675_v8  ;;  %679 = vadd.xlane.f32.xlu1 %v678_v14  ;;  %v2825_v8 = vmul.f32 %v2675_v38, %v903_v5  ;;  %v1985_v14 = vpop.f32.mrb[28].mxu1 }
 0x13a   :  { %v1865_v23 = vpack.c.bf16 %v1985_v14, %v1985_v14  ;;  %v2843_v26 = vmul.f32 %v1985_v14, %v2707_v6  ;;  %v1265_v21 = vpop.f32.mrb[29].mxu1 }
 0x13b   :  { %v1863_v47 = vpack.c.bf16 %v1265_v21, %v1265_v21  ;;  %v2852_v50 = vmul.f32 %v2710_v43, %v1265_v21  ;;  %v1986_v5 = vpop.f32.mrb[30].mxu1 }
 0x13c   :  { %1769 = vst.msk [vmem:[%s3586_s4 + $0xf8] sm:$0xf] %vm249_vm1, %v1865_v23  ;;  %v1866_v48 = vpack.c.bf16 %v1986_v5, %v1986_v5  ;;  %v2859_v42 = vmul.f32 %v1986_v5, %v2707_v6 }
 0x13d   :  { %761 = vadd.xlane.f32.xlu0 %v760_v40  ;;  %764 = vadd.xlane.f32.xlu1 %v763_v17  ;;  %v2846_v40 = vmul.f32 %v1985_v14, %v2710_v43  ;;  %v2849_v17 = vmul.f32 %v2707_v6, %v1265_v21  ;;  %v414_v14 = vsel %vm286_vm2, %v2445_v56, 0.0  ;;  %1767 = vst.msk [vmem:[%s3586_s4 + $0xf0] sm:$0xf] %vm249_vm1, %v1863_v47  ;;  %v417_v21 = vsel %vm286_vm2, %v2459_v62, 0.0 }
 0x13e   :  { %1770 = vst.msk [vmem:[%s3586_s4 + $0xfc] sm:$0xf] %vm249_vm1, %v1866_v48  ;;  %v693_v62 = vsel %vm286_vm2, %v2462_v2, 0.0  ;;  %v696_v47 = vsel %vm286_vm2, %v2478_v12, 0.0  ;;  %v778_v48 = vsel %vm286_vm2, %v2481_v15, 0.0  ;;  %v408_v2 = vsel %vm286_vm2, %v2503_v25, 0.0 }
 0x13f   :  { %v411_v12 = vsel %vm286_vm2, %v2509_v44, 0.0  ;;  %v687_v15 = vsel %vm286_vm2, %v2516_v53, 0.0  ;;  %v1002_v25 = vmul.f32 %v2434_v49, %v2675_v38  ;;  %v1003_v44 = vmul.f32 %v2464_v3, %v2675_v38 }
 0x141   :  { %330 = vadd.xlane.f32.xlu0 %v329_v9  ;;  %333 = vadd.xlane.f32.xlu1 %v332_v41  ;;  %v2862_v9 = vmul.f32 %v1986_v5, %v2710_v43  ;;  %v1268_v41 = vpop.f32.mrb[31].mxu1  ;;  %v1022_v53 = vsel %vm286_vm2, %v1002_v25, 0.0 }
 0x142   :  { %v1864_v23 = vpack.c.bf16 %v1268_v41, %v1268_v41  ;;  %v2877_v5 = vmul.f32 %v2707_v6, %v1268_v41  ;;  %v2880_v56 = vmul.f32 %v2710_v43, %v1268_v41  ;;  %v323_v41 = vsel %vm286_vm2, %v2492_v30, 0.0 }
 0x143   :  { %v772_v30 = vsel %vm286_vm2, %v2534_v60, 0.0  ;;  %v1088_v60 = vmul.f32 %v2464_v3, %v2667_v7 }
 0x144   :  { %1768 = vst.msk [vmem:[%s3586_s4 + $0xf4] sm:$0xf] %vm249_vm1, %v1864_v23  ;;  %v1087_v23 = vmul.f32 %v2434_v49, %v2667_v7 }
 0x145   :  { %415 = vadd.xlane.f32.xlu0 %v414_v14  ;;  %418 = vadd.xlane.f32.xlu1 %v417_v21  ;;  %v781_v14 = vsel %vm286_vm2, %v2484_v22, 0.0  ;;  %v326_v21 = vsel %vm286_vm2, %v2495_v32, 0.0  ;;  %v690_v22 = vsel %vm286_vm2, %v2522_v51, 0.0  ;;  %v775_v32 = vsel %vm286_vm2, %v2544_v20, 0.0 }
 0x146   :  { %v1025_v51 = vsel %vm286_vm2, %v1003_v44, 0.0  ;;  %v1107_v20 = vsel %vm286_vm2, %v1087_v23, 0.0 }
 0x149   :  { %694 = vadd.xlane.f32.xlu0 %v693_v62  ;;  %697 = vadd.xlane.f32.xlu1 %v696_v47  ;;  %v1110_v62 = vsel %vm286_vm2, %v1088_v60, 0.0  ;;  %v3606_v47 = vld [vmem:[#allocation3_spill] sm:$0xff] }
 0x14a   :  { %v1452_v3 = vmul.f32 %v3606_v47, %v2710_v43 }
 0x14d   :  { %779 = vadd.xlane.f32.xlu0 %v778_v48  ;;  %782 = vadd.xlane.f32.xlu1 %v781_v14  ;;  %v1367_v48 = vmul.f32 %v3606_v47, %v2707_v6  ;;  %v3607_v14 = vld [vmem:[#allocation6_spill] sm:$0xff] }
 0x151   :  { %324 = vadd.xlane.f32.xlu0 %v323_v41  ;;  %327 = vadd.xlane.f32.xlu1 %v326_v21  ;;  %v1368_v41 = vmul.f32 %v3607_v14, %v2707_v6  ;;  %v1387_v21 = vsel %vm286_vm2, %v1367_v48, 0.0 }
 0x153   :  { %v1390_v49 = vsel %vm286_vm2, %v1368_v41, 0.0  ;;  %v3610_v41 = vld [vmem:[#allocation4_spill] sm:$0xff] }
 0x155   :  { %409 = vadd.xlane.f32.xlu0 %v408_v2  ;;  %412 = vadd.xlane.f32.xlu1 %v411_v12  ;;  %v1453_v2 = vmul.f32 %v3607_v14, %v2710_v43  ;;  %v1472_v12 = vsel %vm286_vm2, %v1452_v3, 0.0 }
 0x159   :  { %688 = vadd.xlane.f32.xlu0 %v687_v15  ;;  %691 = vadd.xlane.f32.xlu1 %v690_v22  ;;  %v1475_v15 = vsel %vm286_vm2, %v1453_v2, 0.0  ;;  %v3608_v22 = vld [vmem:[#allocation2_spill] sm:$0xff] }
 0x15a   :  { %v1085_v60 = vmul.f32 %v2667_v7, %v3608_v22 }
 0x15c   :  { %v1101_v48 = vsel %vm286_vm2, %v1085_v60, 0.0 }
 0x15d   :  { %773 = vadd.xlane.f32.xlu0 %v772_v30  ;;  %776 = vadd.xlane.f32.xlu1 %v775_v32  ;;  %v1000_v30 = vmul.f32 %v2675_v38, %v3608_v22  ;;  %v3609_v32 = vld [vmem:[#allocation5_spill] sm:$0xff]  ;;  %v1450_v22 = vmul.f32 %v2710_v43, %v3610_v41 }
 0x15e   :  { %v1001_v25 = vmul.f32 %v2675_v38, %v3609_v32 }
 0x160   :  { %v1019_v23 = vsel %vm286_vm2, %v1001_v25, 0.0 }
 0x161   :  { %1023 = vadd.xlane.f32.xlu0 %v1022_v53  ;;  %1026 = vadd.xlane.f32.xlu1 %v1025_v51  ;;  %v1016_v51 = vsel %vm286_vm2, %v1000_v30, 0.0  ;;  %v1451_v30 = vmul.f32 %v2710_v43, %v2497_v34 }
 0x165   :  { %1108 = vadd.xlane.f32.xlu0 %v1107_v20  ;;  %1111 = vadd.xlane.f32.xlu1 %v1110_v62  ;;  %v1086_v20 = vmul.f32 %v2667_v7, %v3609_v32 }
 0x167   :  { %v1104_v14 = vsel %vm286_vm2, %v1086_v20, 0.0 }
 0x169   :  { %1388 = vadd.xlane.f32.xlu0 %v1387_v21  ;;  %1391 = vadd.xlane.f32.xlu1 %v1390_v49  ;;  %v1365_v21 = vmul.f32 %v2707_v6, %v3610_v41  ;;  %v1366_v49 = vmul.f32 %v2707_v6, %v2497_v34  ;;  %v1006_v34 = vmul.f32 %v2536_v4, %v2675_v38 }
 0x16b   :  { %v1034_v20 = vsel %vm286_vm2, %v1006_v34, 0.0 }
 0x16d   :  { %1473 = vadd.xlane.f32.xlu0 %v1472_v12  ;;  %1476 = vadd.xlane.f32.xlu1 %v1475_v15  ;;  %v1381_v12 = vsel %vm286_vm2, %v1365_v21, 0.0  ;;  %v1384_v15 = vsel %vm286_vm2, %v1366_v49, 0.0  ;;  %v1372_v49 = vmul.f32 %v2582_v29, %v2707_v6 }
 0x16e   :  { %v380_v44 = vpop.xlane.xlu0 %379  ;;  %v295_v53 = vpop.xlane.xlu1 %294 }
 0x16f   :  { %422 = vst.msk [vmem:[%s3587_s6 + $0x10] sm:$0xff] %vm335_vm3, %v380_v44  ;;  %338 = vst.msk [vmem:[%s3588_s5 + $0x10] sm:$0xff] %vm335_vm3, %v295_v53  ;;  %v1466_v44 = vsel %vm286_vm2, %v1450_v22, 0.0  ;;  %v1469_v53 = vsel %vm286_vm2, %v1451_v30, 0.0  ;;  %v1456_v22 = vmul.f32 %v2550_v37, %v2710_v43  ;;  %v1457_v30 = vmul.f32 %v2582_v29, %v2710_v43 }
 0x170   :  { %v1004_v29 = vmul.f32 %v2675_v38, %v2548_v46 }
 0x171   :  { %1017 = vadd.xlane.f32.xlu0 %v1016_v51  ;;  %1020 = vadd.xlane.f32.xlu1 %v1019_v23  ;;  %v1007_v51 = vmul.f32 %v2566_v27, %v2675_v38 }
 0x172   :  { %v659_v62 = vpop.xlane.xlu0 %658  ;;  %v298_v47 = vpop.xlane.xlu1 %297 }
 0x173   :  { %1617 = vst.msk [vmem:[%s3588_s5 + $0x90] sm:$0xff] %vm335_vm3, %v659_v62  ;;  %339 = vst.msk [vmem:[%s3588_s5 + $0x18] sm:$0xff] %vm335_vm3, %v298_v47  ;;  %v1037_v62 = vsel %vm286_vm2, %v1007_v51, 0.0  ;;  %v1091_v47 = vmul.f32 %v2536_v4, %v2667_v7 }
 0x175   :  { %1102 = vadd.xlane.f32.xlu0 %v1101_v48  ;;  %1105 = vadd.xlane.f32.xlu1 %v1104_v14  ;;  %v1092_v48 = vmul.f32 %v2566_v27, %v2667_v7  ;;  %v1119_v21 = vsel %vm286_vm2, %v1091_v47, 0.0  ;;  %v1371_v27 = vmul.f32 %v2550_v37, %v2707_v6  ;;  %v1487_v37 = vsel %vm286_vm2, %v1457_v30, 0.0 }
 0x176   :  { %v744_v3 = vpop.xlane.xlu0 %743  ;;  %v383_v2 = vpop.xlane.xlu1 %382 }
 0x177   :  { %1633 = vst.msk [vmem:[%s3587_s6 + $0x90] sm:$0xff] %vm335_vm3, %v744_v3  ;;  %423 = vst.msk [vmem:[%s3587_s6 + $0x18] sm:$0xff] %vm335_vm3, %v383_v2  ;;  %v1122_v4 = vsel %vm286_vm2, %v1092_v48, 0.0 }
 0x179   :  { %1382 = vadd.xlane.f32.xlu0 %v1381_v12  ;;  %1385 = vadd.xlane.f32.xlu1 %v1384_v15  ;;  %v1399_v12 = vsel %vm286_vm2, %v1371_v27, 0.0  ;;  %v1402_v15 = vsel %vm286_vm2, %v1372_v49, 0.0  ;;  %v1455_v27 = vmul.f32 %v2710_v43, %v2592_v19 }
 0x17a   :  { %v289_v32 = vpop.xlane.xlu0 %288  ;;  %v662_v25 = vpop.xlane.xlu1 %661 }
 0x17b   :  { %336 = vst.msk [vmem:[%s3588_s5] sm:$0xff] %vm335_vm3, %v289_v32  ;;  %1618 = vst.msk [vmem:[%s3588_s5 + $0x98] sm:$0xff] %vm335_vm3, %v662_v25 }
 0x17d   :  { %1467 = vadd.xlane.f32.xlu0 %v1466_v44  ;;  %1470 = vadd.xlane.f32.xlu1 %v1469_v53  ;;  %v1484_v44 = vsel %vm286_vm2, %v1456_v22, 0.0  ;;  %v1005_v53 = vmul.f32 %v2675_v38, %v2580_v18  ;;  %v1089_v38 = vmul.f32 %v2667_v7, %v2548_v46 }
 0x17e   :  { %v374_v23 = vpop.xlane.xlu0 %373  ;;  %v747_v60 = vpop.xlane.xlu1 %746 }
 0x17f   :  { %420 = vst.msk [vmem:[%s3587_s6] sm:$0xff] %vm335_vm3, %v374_v23  ;;  %1634 = vst.msk [vmem:[%s3587_s6 + $0x98] sm:$0xff] %vm335_vm3, %v747_v60  ;;  %v1028_v23 = vsel %vm286_vm2, %v1004_v29, 0.0  ;;  %v1031_v60 = vsel %vm286_vm2, %v1005_v53, 0.0  ;;  %v1113_v48 = vsel %vm286_vm2, %v1089_v38, 0.0 }
 0x181   :  { %1035 = vadd.xlane.f32.xlu0 %v1034_v20  ;;  %1038 = vadd.xlane.f32.xlu1 %v1037_v62  ;;  %v1090_v20 = vmul.f32 %v2667_v7, %v2580_v18  ;;  %v1369_v18 = vmul.f32 %v2707_v6, %v2568_v58  ;;  %v1370_v7 = vmul.f32 %v2707_v6, %v2592_v19 }
 0x182   :  { %v653_v14 = vpop.xlane.xlu0 %652  ;;  %v377_v41 = vpop.xlane.xlu1 %376  ;;  %v1454_v6 = vmul.f32 %v2710_v43, %v2568_v58  ;;  %v1481_v58 = vsel %vm286_vm2, %v1455_v27, 0.0 }
 0x183   :  { %1615 = vst.msk [vmem:[%s3588_s5 + $0x80] sm:$0xff] %vm335_vm3, %v653_v14  ;;  %421 = vst.msk [vmem:[%s3587_s6 + $0x8] sm:$0xff] %vm335_vm3, %v377_v41  ;;  %v1116_v46 = vsel %vm286_vm2, %v1090_v20, 0.0  ;;  %v1408_v20 = vsel %vm286_vm2, %v2765_v24, 0.0  ;;  %v1493_v24 = vsel %vm286_vm2, %v2768_v63, 0.0  ;;  %v1061_v63 = vsel %vm286_vm2, %v2819_v13, 0.0 }
 0x184   :  { %v1146_v13 = vsel %vm286_vm2, %v2822_v1, 0.0  ;;  %v1426_v1 = vsel %vm286_vm2, %v2859_v42, 0.0  ;;  %v1055_v42 = vsel %vm286_vm2, %v2825_v8, 0.0  ;;  %v1140_v8 = vsel %vm286_vm2, %v2828_v45, 0.0 }
 0x185   :  { %1120 = vadd.xlane.f32.xlu0 %v1119_v21  ;;  %1123 = vadd.xlane.f32.xlu1 %v1122_v4  ;;  %v1393_v21 = vsel %vm286_vm2, %v1369_v18, 0.0  ;;  %v1396_v4 = vsel %vm286_vm2, %v1370_v7, 0.0  ;;  %v1058_v7 = vsel %vm286_vm2, %v2795_v61, 0.0  ;;  %v1143_v61 = vsel %vm286_vm2, %v2798_v0, 0.0 }
 0x186   :  { %v738_v3 = vpop.xlane.xlu0 %737  ;;  %v656_v2 = vpop.xlane.xlu1 %655  ;;  %v1423_v0 = vsel %vm286_vm2, %v2843_v26, 0.0  ;;  %v1052_v26 = vsel %vm286_vm2, %v2805_v31, 0.0  ;;  %v1137_v31 = vsel %vm286_vm2, %v2808_v55, 0.0  ;;  %v1417_v55 = vsel %vm286_vm2, %v2849_v17, 0.0 }
 0x187   :  { %1631 = vst.msk [vmem:[%s3587_s6 + $0x80] sm:$0xff] %vm335_vm3, %v738_v3  ;;  %1616 = vst.msk [vmem:[%s3588_s5 + $0x88] sm:$0xff] %vm335_vm3, %v656_v2  ;;  %v1478_v2 = vsel %vm286_vm2, %v1454_v6, 0.0  ;;  %v1420_v45 = vsel %vm286_vm2, %v2877_v5, 0.0  ;;  %v1502_v17 = vsel %vm286_vm2, %v2852_v50, 0.0  ;;  %v1505_v5 = vsel %vm286_vm2, %v2880_v56, 0.0 }
 0x188   :  { %v1508_v50 = vsel %vm286_vm2, %v2846_v40, 0.0  ;;  %v1511_v56 = vsel %vm286_vm2, %v2862_v9, 0.0 }
 0x189   :  { %1400 = vadd.xlane.f32.xlu0 %v1399_v12  ;;  %1403 = vadd.xlane.f32.xlu1 %v1402_v15  ;;  %v1046_v12 = vsel %vm286_vm2, %v2723_v36, 0.0  ;;  %v1049_v15 = vsel %vm286_vm2, %v2744_v57, 0.0  ;;  %v1131_v36 = vsel %vm286_vm2, %v2678_v59, 0.0  ;;  %v1134_v57 = vsel %vm286_vm2, %v2698_v54, 0.0 }
 0x18a   :  { %v741_v32 = vpop.xlane.xlu1 %740  ;;  %v292_v25 = vpop.xlane.xlu0 %291  ;;  %v1411_v59 = vsel %vm286_vm2, %v2728_v11, 0.0  ;;  %v1414_v54 = vsel %vm286_vm2, %v2747_v28, 0.0  ;;  %v1496_v11 = vsel %vm286_vm2, %v2731_v33, 0.0  ;;  %v1499_v28 = vsel %vm286_vm2, %v2750_v35, 0.0 }
 0x18b   :  { %1632 = vst.msk [vmem:[%s3587_s6 + $0x88] sm:$0xff] %vm335_vm3, %v741_v32  ;;  %337 = vst.msk [vmem:[%s3588_s5 + $0x8] sm:$0xff] %vm335_vm3, %v292_v25  ;;  %v1040_v33 = vsel %vm286_vm2, %v2682_v10, 0.0  ;;  %v1043_v35 = vsel %vm286_vm2, %v2701_v16, 0.0  ;;  %v1125_v10 = vsel %vm286_vm2, %v2689_v52, 0.0  ;;  %v1405_v52 = vsel %vm286_vm2, %v2734_v39, 0.0 }
 0x18d   :  { %1485 = vadd.xlane.f32.xlu0 %v1484_v44  ;;  %1488 = vadd.xlane.f32.xlu1 %v1487_v37 }
 0x18e   :  { %v307_v34 = vpop.xlane.xlu0 %306  ;;  %v310_v51 = vpop.xlane.xlu1 %309 }
 0x18f   :  { %342 = vst.msk [vmem:[%s3588_s5 + $0x30] sm:$0xff] %vm335_vm3, %v307_v34  ;;  %343 = vst.msk [vmem:[%s3588_s5 + $0x38] sm:$0xff] %vm335_vm3, %v310_v51 }
 0x191   :  { %1029 = vadd.xlane.f32.xlu0 %v1028_v23  ;;  %1032 = vadd.xlane.f32.xlu1 %v1031_v60  ;;  %v3611_v23 = vld [vmem:[#allocation7_spill] sm:$0xff] }
 0x192   :  { %v392_v62 = vpop.xlane.xlu0 %391  ;;  %v395_v47 = vpop.xlane.xlu1 %394  ;;  %v1128_v16 = vsel %vm286_vm2, %v3611_v23, 0.0 }
 0x193   :  { %426 = vst.msk [vmem:[%s3587_s6 + $0x30] sm:$0xff] %vm335_vm3, %v392_v62  ;;  %427 = vst.msk [vmem:[%s3587_s6 + $0x38] sm:$0xff] %vm335_vm3, %v395_v47 }
 0x195   :  { %1114 = vadd.xlane.f32.xlu0 %v1113_v48  ;;  %1117 = vadd.xlane.f32.xlu1 %v1116_v46  ;;  %v3612_v48 = vld [vmem:[#allocation8_spill] sm:$0xff] }
 0x196   :  { %v671_v14 = vpop.xlane.xlu0 %670  ;;  %v674_v41 = vpop.xlane.xlu1 %673  ;;  %v1490_v39 = vsel %vm286_vm2, %v3612_v48, 0.0 }
 0x197   :  { %1621 = vst.msk [vmem:[%s3588_s5 + $0xb0] sm:$0xff] %vm335_vm3, %v671_v14  ;;  %1622 = vst.msk [vmem:[%s3588_s5 + $0xb8] sm:$0xff] %vm335_vm3, %v674_v41 }
 0x199   :  { %1394 = vadd.xlane.f32.xlu0 %v1393_v21  ;;  %1397 = vadd.xlane.f32.xlu1 %v1396_v4 }
 0x19a   :  { %v756_v49 = vpop.xlane.xlu0 %755  ;;  %v759_v3 = vpop.xlane.xlu1 %758 }
 0x19b   :  { %1637 = vst.msk [vmem:[%s3587_s6 + $0xb0] sm:$0xff] %vm335_vm3, %v756_v49  ;;  %1638 = vst.msk [vmem:[%s3587_s6 + $0xb8] sm:$0xff] %vm335_vm3, %v759_v3 }
 0x19d   :  { %1479 = vadd.xlane.f32.xlu0 %v1478_v2  ;;  %1482 = vadd.xlane.f32.xlu1 %v1481_v58 }
 0x19e   :  { %v301_v19 = vpop.xlane.xlu0 %300  ;;  %v304_v43 = vpop.xlane.xlu1 %303 }
 0x19f   :  { %340 = vst.msk [vmem:[%s3588_s5 + $0x20] sm:$0xff] %vm335_vm3, %v301_v19  ;;  %341 = vst.msk [vmem:[%s3588_s5 + $0x28] sm:$0xff] %vm335_vm3, %v304_v43 }
 0x1a1   :  { %1047 = vadd.xlane.f32.xlu0 %v1046_v12  ;;  %1050 = vadd.xlane.f32.xlu1 %v1049_v15 }
 0x1a2   :  { %v386_v22 = vpop.xlane.xlu0 %385  ;;  %v389_v30 = vpop.xlane.xlu1 %388 }
 0x1a3   :  { %424 = vst.msk [vmem:[%s3587_s6 + $0x20] sm:$0xff] %vm335_vm3, %v386_v22  ;;  %425 = vst.msk [vmem:[%s3587_s6 + $0x28] sm:$0xff] %vm335_vm3, %v389_v30 }
 0x1a5   :  { %1132 = vadd.xlane.f32.xlu0 %v1131_v36  ;;  %1135 = vadd.xlane.f32.xlu1 %v1134_v57 }
 0x1a6   :  { %v665_v32 = vpop.xlane.xlu0 %664  ;;  %v668_v25 = vpop.xlane.xlu1 %667 }
 0x1a7   :  { %1619 = vst.msk [vmem:[%s3588_s5 + $0xa0] sm:$0xff] %vm335_vm3, %v665_v32  ;;  %1620 = vst.msk [vmem:[%s3588_s5 + $0xa8] sm:$0xff] %vm335_vm3, %v668_v25 }
 0x1a9   :  { %1412 = vadd.xlane.f32.xlu0 %v1411_v59  ;;  %1415 = vadd.xlane.f32.xlu1 %v1414_v54 }
 0x1aa   :  { %v750_v44 = vpop.xlane.xlu0 %749  ;;  %v753_v37 = vpop.xlane.xlu1 %752 }
 0x1ab   :  { %1635 = vst.msk [vmem:[%s3587_s6 + $0xa0] sm:$0xff] %vm335_vm3, %v750_v44  ;;  %1636 = vst.msk [vmem:[%s3587_s6 + $0xa8] sm:$0xff] %vm335_vm3, %v753_v37 }
 0x1ad   :  { %1497 = vadd.xlane.f32.xlu0 %v1496_v11  ;;  %1500 = vadd.xlane.f32.xlu1 %v1499_v28 }
 0x1ae   :  { %v319_v29 = vpop.xlane.xlu0 %318  ;;  %v322_v53 = vpop.xlane.xlu1 %321 }
 0x1af   :  { %346 = vst.msk [vmem:[%s3588_s5 + $0x50] sm:$0xff] %vm335_vm3, %v319_v29  ;;  %347 = vst.msk [vmem:[%s3588_s5 + $0x58] sm:$0xff] %vm335_vm3, %v322_v53 }
 0x1b1   :  { %1041 = vadd.xlane.f32.xlu0 %v1040_v33  ;;  %1044 = vadd.xlane.f32.xlu1 %v1043_v35 }
 0x1b2   :  { %v404_v34 = vpop.xlane.xlu0 %403  ;;  %v407_v51 = vpop.xlane.xlu1 %406 }
 0x1b3   :  { %430 = vst.msk [vmem:[%s3587_s6 + $0x50] sm:$0xff] %vm335_vm3, %v404_v34  ;;  %431 = vst.msk [vmem:[%s3587_s6 + $0x58] sm:$0xff] %vm335_vm3, %v407_v51 }
 0x1b5   :  { %1126 = vadd.xlane.f32.xlu0 %v1125_v10  ;;  %1129 = vadd.xlane.f32.xlu1 %v1128_v16 }
 0x1b6   :  { %v683_v60 = vpop.xlane.xlu0 %682  ;;  %v686_v38 = vpop.xlane.xlu1 %685 }
 0x1b7   :  { %1625 = vst.msk [vmem:[%s3588_s5 + $0xd0] sm:$0xff] %vm335_vm3, %v683_v60  ;;  %1626 = vst.msk [vmem:[%s3588_s5 + $0xd8] sm:$0xff] %vm335_vm3, %v686_v38 }
 0x1b9   :  { %1406 = vadd.xlane.f32.xlu0 %v1405_v52  ;;  %1409 = vadd.xlane.f32.xlu1 %v1408_v20 }
 0x1ba   :  { %v768_v62 = vpop.xlane.xlu0 %767  ;;  %v771_v47 = vpop.xlane.xlu1 %770 }
 0x1bb   :  { %1641 = vst.msk [vmem:[%s3587_s6 + $0xd0] sm:$0xff] %vm335_vm3, %v768_v62  ;;  %1642 = vst.msk [vmem:[%s3587_s6 + $0xd8] sm:$0xff] %vm335_vm3, %v771_v47 }
 0x1bd   :  { %1491 = vadd.xlane.f32.xlu0 %v1490_v39  ;;  %1494 = vadd.xlane.f32.xlu1 %v1493_v24 }
 0x1be   :  { %v313_v46 = vpop.xlane.xlu0 %312  ;;  %v316_v18 = vpop.xlane.xlu1 %315 }
 0x1bf   :  { %344 = vst.msk [vmem:[%s3588_s5 + $0x40] sm:$0xff] %vm335_vm3, %v313_v46  ;;  %345 = vst.msk [vmem:[%s3588_s5 + $0x48] sm:$0xff] %vm335_vm3, %v316_v18 }
 0x1c1   :  { %1059 = vadd.xlane.f32.xlu0 %v1058_v7  ;;  %1062 = vadd.xlane.f32.xlu1 %v1061_v63 }
 0x1c2   :  { %v398_v14 = vpop.xlane.xlu0 %397  ;;  %v401_v41 = vpop.xlane.xlu1 %400 }
 0x1c3   :  { %428 = vst.msk [vmem:[%s3587_s6 + $0x40] sm:$0xff] %vm335_vm3, %v398_v14  ;;  %429 = vst.msk [vmem:[%s3587_s6 + $0x48] sm:$0xff] %vm335_vm3, %v401_v41 }
 0x1c5   :  { %1144 = vadd.xlane.f32.xlu0 %v1143_v61  ;;  %1147 = vadd.xlane.f32.xlu1 %v1146_v13 }
 0x1c6   :  { %v677_v21 = vpop.xlane.xlu0 %676  ;;  %v680_v4 = vpop.xlane.xlu1 %679 }
 0x1c7   :  { %1623 = vst.msk [vmem:[%s3588_s5 + $0xc0] sm:$0xff] %vm335_vm3, %v677_v21  ;;  %1624 = vst.msk [vmem:[%s3588_s5 + $0xc8] sm:$0xff] %vm335_vm3, %v680_v4 }
 0x1c9   :  { %1424 = vadd.xlane.f32.xlu0 %v1423_v0  ;;  %1427 = vadd.xlane.f32.xlu1 %v1426_v1 }
 0x1ca   :  { %v762_v6 = vpop.xlane.xlu0 %761  ;;  %v765_v27 = vpop.xlane.xlu1 %764 }
 0x1cb   :  { %1639 = vst.msk [vmem:[%s3587_s6 + $0xc0] sm:$0xff] %vm335_vm3, %v762_v6  ;;  %1640 = vst.msk [vmem:[%s3587_s6 + $0xc8] sm:$0xff] %vm335_vm3, %v765_v27 }
 0x1cd   :  { %1053 = vadd.xlane.f32.xlu0 %v1052_v26  ;;  %1056 = vadd.xlane.f32.xlu1 %v1055_v42 }
 0x1ce   :  { %v331_v49 = vpop.xlane.xlu0 %330  ;;  %v334_v3 = vpop.xlane.xlu1 %333 }
 0x1cf   :  { %350 = vst.msk [vmem:[%s3588_s5 + $0x70] sm:$0xff] %vm335_vm3, %v331_v49  ;;  %351 = vst.msk [vmem:[%s3588_s5 + $0x78] sm:$0xff] %vm335_vm3, %v334_v3 }
 0x1d1   :  { %1138 = vadd.xlane.f32.xlu0 %v1137_v31  ;;  %1141 = vadd.xlane.f32.xlu1 %v1140_v8 }
 0x1d2   :  { %v416_v2 = vpop.xlane.xlu0 %415  ;;  %v419_v58 = vpop.xlane.xlu1 %418 }
 0x1d3   :  { %434 = vst.msk [vmem:[%s3587_s6 + $0x70] sm:$0xff] %vm335_vm3, %v416_v2  ;;  %435 = vst.msk [vmem:[%s3587_s6 + $0x78] sm:$0xff] %vm335_vm3, %v419_v58 }
 0x1d5   :  { %1418 = vadd.xlane.f32.xlu0 %v1417_v55  ;;  %1421 = vadd.xlane.f32.xlu1 %v1420_v45 }
 0x1d6   :  { %v695_v19 = vpop.xlane.xlu0 %694  ;;  %v698_v43 = vpop.xlane.xlu1 %697 }
 0x1d7   :  { %1629 = vst.msk [vmem:[%s3588_s5 + $0xf0] sm:$0xff] %vm335_vm3, %v695_v19  ;;  %1630 = vst.msk [vmem:[%s3588_s5 + $0xf8] sm:$0xff] %vm335_vm3, %v698_v43 }
 0x1d9   :  { %1503 = vadd.xlane.f32.xlu0 %v1502_v17  ;;  %1506 = vadd.xlane.f32.xlu1 %v1505_v5 }
 0x1da   :  { %v780_v12 = vpop.xlane.xlu0 %779  ;;  %v783_v15 = vpop.xlane.xlu1 %782 }
 0x1db   :  { %1645 = vst.msk [vmem:[%s3587_s6 + $0xf0] sm:$0xff] %vm335_vm3, %v780_v12  ;;  %1646 = vst.msk [vmem:[%s3587_s6 + $0xf8] sm:$0xff] %vm335_vm3, %v783_v15 }
 0x1dd   :  { %1509 = vadd.xlane.f32.xlu0 %v1508_v50  ;;  %1512 = vadd.xlane.f32.xlu1 %v1511_v56 }
 0x1de   :  { %v325_v22 = vpop.xlane.xlu0 %324  ;;  %v328_v30 = vpop.xlane.xlu1 %327 }
 0x1df   :  { %348 = vst.msk [vmem:[%s3588_s5 + $0x60] sm:$0xff] %vm335_vm3, %v325_v22  ;;  %349 = vst.msk [vmem:[%s3588_s5 + $0x68] sm:$0xff] %vm335_vm3, %v328_v30 }
 0x1e2   :  { %v410_v36 = vpop.xlane.xlu0 %409  ;;  %v413_v57 = vpop.xlane.xlu1 %412 }
 0x1e3   :  { %432 = vst.msk [vmem:[%s3587_s6 + $0x60] sm:$0xff] %vm335_vm3, %v410_v36  ;;  %433 = vst.msk [vmem:[%s3587_s6 + $0x68] sm:$0xff] %vm335_vm3, %v413_v57 }
 0x1e6   :  { %v689_v40 = vpop.xlane.xlu0 %688  ;;  %v692_v9 = vpop.xlane.xlu1 %691 }
 0x1e7   :  { %1627 = vst.msk [vmem:[%s3588_s5 + $0xe0] sm:$0xff] %vm335_vm3, %v689_v40  ;;  %1628 = vst.msk [vmem:[%s3588_s5 + $0xe8] sm:$0xff] %vm335_vm3, %v692_v9 }
 0x1ea   :  { %v774_v32 = vpop.xlane.xlu0 %773  ;;  %v777_v25 = vpop.xlane.xlu1 %776 }
 0x1eb   :  { %1643 = vst.msk [vmem:[%s3587_s6 + $0xe0] sm:$0xff] %vm335_vm3, %v774_v32  ;;  %1644 = vst.msk [vmem:[%s3587_s6 + $0xe8] sm:$0xff] %vm335_vm3, %v777_v25 }
 0x1ee   :  { %v1024_v59 = vpop.xlane.xlu0 %1023  ;;  %v1027_v54 = vpop.xlane.xlu1 %1026 }
 0x1ef   :  { %1695 = vst.msk [vmem:[%s3588_s5 + $0x110] sm:$0xff] %vm335_vm3, %v1024_v59  ;;  %1696 = vst.msk [vmem:[%s3588_s5 + $0x118] sm:$0xff] %vm335_vm3, %v1027_v54 }
 0x1f2   :  { %v1109_v44 = vpop.xlane.xlu0 %1108  ;;  %v1112_v37 = vpop.xlane.xlu1 %1111 }
 0x1f3   :  { %1711 = vst.msk [vmem:[%s3587_s6 + $0x110] sm:$0xff] %vm335_vm3, %v1109_v44  ;;  %1712 = vst.msk [vmem:[%s3587_s6 + $0x118] sm:$0xff] %vm335_vm3, %v1112_v37 }
 0x1f6   :  { %v1389_v11 = vpop.xlane.xlu0 %1388  ;;  %v1392_v28 = vpop.xlane.xlu1 %1391 }
 0x1f7   :  { %1773 = vst.msk [vmem:[%s3588_s5 + $0x190] sm:$0xff] %vm335_vm3, %v1389_v11  ;;  %1774 = vst.msk [vmem:[%s3588_s5 + $0x198] sm:$0xff] %vm335_vm3, %v1392_v28 }
 0x1fa   :  { %v1474_v29 = vpop.xlane.xlu0 %1473  ;;  %v1477_v53 = vpop.xlane.xlu1 %1476 }
 0x1fb   :  { %1789 = vst.msk [vmem:[%s3587_s6 + $0x190] sm:$0xff] %vm335_vm3, %v1474_v29  ;;  %1790 = vst.msk [vmem:[%s3587_s6 + $0x198] sm:$0xff] %vm335_vm3, %v1477_v53 }
 0x1fe   :  { %v1018_v33 = vpop.xlane.xlu0 %1017  ;;  %v1021_v35 = vpop.xlane.xlu1 %1020 }
 0x1ff   :  { %1693 = vst.msk [vmem:[%s3588_s5 + $0x100] sm:$0xff] %vm335_vm3, %v1018_v33  ;;  %1694 = vst.msk [vmem:[%s3588_s5 + $0x108] sm:$0xff] %vm335_vm3, %v1021_v35 }
 0x202   :  { %v1103_v34 = vpop.xlane.xlu0 %1102  ;;  %v1106_v51 = vpop.xlane.xlu1 %1105 }
 0x203   :  { %1709 = vst.msk [vmem:[%s3587_s6 + $0x100] sm:$0xff] %vm335_vm3, %v1103_v34  ;;  %1710 = vst.msk [vmem:[%s3587_s6 + $0x108] sm:$0xff] %vm335_vm3, %v1106_v51 }
 0x206   :  { %v1383_v10 = vpop.xlane.xlu0 %1382  ;;  %v1386_v23 = vpop.xlane.xlu1 %1385 }
 0x207   :  { %1771 = vst.msk [vmem:[%s3588_s5 + $0x180] sm:$0xff] %vm335_vm3, %v1383_v10  ;;  %1772 = vst.msk [vmem:[%s3588_s5 + $0x188] sm:$0xff] %vm335_vm3, %v1386_v23 }
 0x20a   :  { %v1468_v16 = vpop.xlane.xlu0 %1467  ;;  %v1471_v60 = vpop.xlane.xlu1 %1470 }
 0x20b   :  { %1787 = vst.msk [vmem:[%s3587_s6 + $0x180] sm:$0xff] %vm335_vm3, %v1468_v16  ;;  %1788 = vst.msk [vmem:[%s3587_s6 + $0x188] sm:$0xff] %vm335_vm3, %v1471_v60 }
 0x20e   :  { %v1036_v38 = vpop.xlane.xlu0 %1035  ;;  %v1039_v52 = vpop.xlane.xlu1 %1038 }
 0x20f   :  { %1699 = vst.msk [vmem:[%s3588_s5 + $0x130] sm:$0xff] %vm335_vm3, %v1036_v38  ;;  %1700 = vst.msk [vmem:[%s3588_s5 + $0x138] sm:$0xff] %vm335_vm3, %v1039_v52 }
 0x212   :  { %v1121_v20 = vpop.xlane.xlu0 %1120  ;;  %v1124_v62 = vpop.xlane.xlu1 %1123 }
 0x213   :  { %1715 = vst.msk [vmem:[%s3587_s6 + $0x130] sm:$0xff] %vm335_vm3, %v1121_v20  ;;  %1716 = vst.msk [vmem:[%s3587_s6 + $0x138] sm:$0xff] %vm335_vm3, %v1124_v62 }
 0x216   :  { %v1401_v47 = vpop.xlane.xlu0 %1400  ;;  %v1404_v48 = vpop.xlane.xlu1 %1403 }
 0x217   :  { %1777 = vst.msk [vmem:[%s3588_s5 + $0x1b0] sm:$0xff] %vm335_vm3, %v1401_v47  ;;  %1778 = vst.msk [vmem:[%s3588_s5 + $0x1b8] sm:$0xff] %vm335_vm3, %v1404_v48 }
 0x21a   :  { %v1486_v39 = vpop.xlane.xlu0 %1485  ;;  %v1489_v24 = vpop.xlane.xlu1 %1488 }
 0x21b   :  { %1793 = vst.msk [vmem:[%s3587_s6 + $0x1b0] sm:$0xff] %vm335_vm3, %v1486_v39  ;;  %1794 = vst.msk [vmem:[%s3587_s6 + $0x1b8] sm:$0xff] %vm335_vm3, %v1489_v24 }
 0x21e   :  { %v1030_v46 = vpop.xlane.xlu0 %1029  ;;  %v1033_v18 = vpop.xlane.xlu1 %1032 }
 0x21f   :  { %1697 = vst.msk [vmem:[%s3588_s5 + $0x120] sm:$0xff] %vm335_vm3, %v1030_v46  ;;  %1698 = vst.msk [vmem:[%s3588_s5 + $0x128] sm:$0xff] %vm335_vm3, %v1033_v18 }
 0x222   :  { %v1115_v7 = vpop.xlane.xlu0 %1114  ;;  %v1118_v63 = vpop.xlane.xlu1 %1117 }
 0x223   :  { %1713 = vst.msk [vmem:[%s3587_s6 + $0x120] sm:$0xff] %vm335_vm3, %v1115_v7  ;;  %1714 = vst.msk [vmem:[%s3587_s6 + $0x128] sm:$0xff] %vm335_vm3, %v1118_v63 }
 0x226   :  { %v1395_v14 = vpop.xlane.xlu0 %1394  ;;  %v1398_v41 = vpop.xlane.xlu1 %1397 }
 0x227   :  { %1775 = vst.msk [vmem:[%s3588_s5 + $0x1a0] sm:$0xff] %vm335_vm3, %v1395_v14  ;;  %1776 = vst.msk [vmem:[%s3588_s5 + $0x1a8] sm:$0xff] %vm335_vm3, %v1398_v41 }
 0x22a   :  { %v1480_v61 = vpop.xlane.xlu0 %1479  ;;  %v1483_v13 = vpop.xlane.xlu1 %1482 }
 0x22b   :  { %1791 = vst.msk [vmem:[%s3587_s6 + $0x1a0] sm:$0xff] %vm335_vm3, %v1480_v61  ;;  %1792 = vst.msk [vmem:[%s3587_s6 + $0x1a8] sm:$0xff] %vm335_vm3, %v1483_v13 }
 0x22e   :  { %v1048_v21 = vpop.xlane.xlu0 %1047  ;;  %v1051_v4 = vpop.xlane.xlu1 %1050 }
 0x22f   :  { %1703 = vst.msk [vmem:[%s3588_s5 + $0x150] sm:$0xff] %vm335_vm3, %v1048_v21  ;;  %1704 = vst.msk [vmem:[%s3588_s5 + $0x158] sm:$0xff] %vm335_vm3, %v1051_v4 }
 0x232   :  { %v1133_v0 = vpop.xlane.xlu0 %1132  ;;  %v1136_v1 = vpop.xlane.xlu1 %1135 }
 0x233   :  { %1719 = vst.msk [vmem:[%s3587_s6 + $0x150] sm:$0xff] %vm335_vm3, %v1133_v0  ;;  %1720 = vst.msk [vmem:[%s3587_s6 + $0x158] sm:$0xff] %vm335_vm3, %v1136_v1 }
 0x236   :  { %v1413_v6 = vpop.xlane.xlu0 %1412  ;;  %v1416_v27 = vpop.xlane.xlu1 %1415 }
 0x237   :  { %1781 = vst.msk [vmem:[%s3588_s5 + $0x1d0] sm:$0xff] %vm335_vm3, %v1413_v6  ;;  %1782 = vst.msk [vmem:[%s3588_s5 + $0x1d8] sm:$0xff] %vm335_vm3, %v1416_v27 }
 0x23a   :  { %v1498_v26 = vpop.xlane.xlu0 %1497  ;;  %v1501_v42 = vpop.xlane.xlu1 %1500 }
 0x23b   :  { %1797 = vst.msk [vmem:[%s3587_s6 + $0x1d0] sm:$0xff] %vm335_vm3, %v1498_v26  ;;  %1798 = vst.msk [vmem:[%s3587_s6 + $0x1d8] sm:$0xff] %vm335_vm3, %v1501_v42 }
 0x23e   :  { %v1042_v49 = vpop.xlane.xlu0 %1041  ;;  %v1045_v3 = vpop.xlane.xlu1 %1044 }
 0x23f   :  { %1701 = vst.msk [vmem:[%s3588_s5 + $0x140] sm:$0xff] %vm335_vm3, %v1042_v49  ;;  %1702 = vst.msk [vmem:[%s3588_s5 + $0x148] sm:$0xff] %vm335_vm3, %v1045_v3 }
 0x242   :  { %v1127_v31 = vpop.xlane.xlu0 %1126  ;;  %v1130_v8 = vpop.xlane.xlu1 %1129 }
 0x243   :  { %1717 = vst.msk [vmem:[%s3587_s6 + $0x140] sm:$0xff] %vm335_vm3, %v1127_v31  ;;  %1718 = vst.msk [vmem:[%s3587_s6 + $0x148] sm:$0xff] %vm335_vm3, %v1130_v8 }
 0x246   :  { %v1407_v2 = vpop.xlane.xlu0 %1406  ;;  %v1410_v58 = vpop.xlane.xlu1 %1409 }
 0x247   :  { %1779 = vst.msk [vmem:[%s3588_s5 + $0x1c0] sm:$0xff] %vm335_vm3, %v1407_v2  ;;  %1780 = vst.msk [vmem:[%s3588_s5 + $0x1c8] sm:$0xff] %vm335_vm3, %v1410_v58 }
 0x24a   :  { %v1492_v55 = vpop.xlane.xlu0 %1491  ;;  %v1495_v45 = vpop.xlane.xlu1 %1494 }
 0x24b   :  { %1795 = vst.msk [vmem:[%s3587_s6 + $0x1c0] sm:$0xff] %vm335_vm3, %v1492_v55  ;;  %1796 = vst.msk [vmem:[%s3587_s6 + $0x1c8] sm:$0xff] %vm335_vm3, %v1495_v45 }
 0x24e   :  { %v1060_v19 = vpop.xlane.xlu0 %1059  ;;  %v1063_v43 = vpop.xlane.xlu1 %1062 }
 0x24f   :  { %1707 = vst.msk [vmem:[%s3588_s5 + $0x170] sm:$0xff] %vm335_vm3, %v1060_v19  ;;  %1708 = vst.msk [vmem:[%s3588_s5 + $0x178] sm:$0xff] %vm335_vm3, %v1063_v43 }
 0x252   :  { %v1145_v17 = vpop.xlane.xlu0 %1144  ;;  %v1148_v5 = vpop.xlane.xlu1 %1147 }
 0x253   :  { %1723 = vst.msk [vmem:[%s3587_s6 + $0x170] sm:$0xff] %vm335_vm3, %v1145_v17  ;;  %1724 = vst.msk [vmem:[%s3587_s6 + $0x178] sm:$0xff] %vm335_vm3, %v1148_v5 }
 0x256   :  { %v1425_v12 = vpop.xlane.xlu0 %1424  ;;  %v1428_v15 = vpop.xlane.xlu1 %1427 }
 0x257   :  { %1785 = vst.msk [vmem:[%s3588_s5 + $0x1f0] sm:$0xff] %vm335_vm3, %v1425_v12  ;;  %1786 = vst.msk [vmem:[%s3588_s5 + $0x1f8] sm:$0xff] %vm335_vm3, %v1428_v15 }
 0x25a   :  { %v1054_v50 = vpop.xlane.xlu0 %1053  ;;  %v1057_v56 = vpop.xlane.xlu1 %1056 }
 0x25b   :  { %1705 = vst.msk [vmem:[%s3588_s5 + $0x160] sm:$0xff] %vm335_vm3, %v1054_v50  ;;  %1706 = vst.msk [vmem:[%s3588_s5 + $0x168] sm:$0xff] %vm335_vm3, %v1057_v56 }
 0x25e   :  { %v1139_v22 = vpop.xlane.xlu0 %1138  ;;  %v1142_v30 = vpop.xlane.xlu1 %1141 }
 0x25f   :  { %1721 = vst.msk [vmem:[%s3587_s6 + $0x160] sm:$0xff] %vm335_vm3, %v1139_v22  ;;  %1722 = vst.msk [vmem:[%s3587_s6 + $0x168] sm:$0xff] %vm335_vm3, %v1142_v30 }
 0x262   :  { %v1419_v36 = vpop.xlane.xlu0 %1418  ;;  %v1422_v57 = vpop.xlane.xlu1 %1421 }
 0x263   :  { %1783 = vst.msk [vmem:[%s3588_s5 + $0x1e0] sm:$0xff] %vm335_vm3, %v1419_v36  ;;  %1784 = vst.msk [vmem:[%s3588_s5 + $0x1e8] sm:$0xff] %vm335_vm3, %v1422_v57 }
 0x266   :  { %v1504_v40 = vpop.xlane.xlu0 %1503  ;;  %v1507_v9 = vpop.xlane.xlu1 %1506 }
 0x267   :  { %1799 = vst.msk [vmem:[%s3587_s6 + $0x1e0] sm:$0xff] %vm335_vm3, %v1504_v40  ;;  %1800 = vst.msk [vmem:[%s3587_s6 + $0x1e8] sm:$0xff] %vm335_vm3, %v1507_v9 }
 0x26a   :  { %v1510_v32 = vpop.xlane.xlu0 %1509  ;;  %v1513_v25 = vpop.xlane.xlu1 %1512 }
 0x26b   :  { %1801 = vst.msk [vmem:[%s3587_s6 + $0x1f0] sm:$0xff] %vm335_vm3, %v1510_v32  ;;  %1802 = vst.msk [vmem:[%s3587_s6 + $0x1f8] sm:$0xff] %vm335_vm3, %v1513_v25 }

</bundles_post_ra>
